<compile_context>
chip_gen: v5e
topology: v5e:2x2
jax: 0.10.0
libtpu: 0.0.40
codegen_flags: <defaults>
</compile_context>

<pallas_src>
import numpy as np

import jax
import jax.numpy as jnp
from jax import lax
from jax.experimental import pallas as pl
from jax.experimental.pallas import tpu as pltpu

NUM_HEADS = 2
LANE = 128  # per-(relation, head) packed block width (one lane tile)


def _gat_layer(h, adj_ref, w_ref, war_ref, wal_ref, bsum_ref, *, apply_relu):
    """One HeteroGraphConv({rel: GATConv}) layer, fully in-registers.

    h:        (N, D_in)        current node features (value); D_in lanes beyond the true width
                               are zero, matching zero rows in the packed weights.
    adj_ref:  (R, N, N)        adj[r, v, u] = 1 iff edge u -> v under relation r
    w_ref:    (D_in, K*128)    per-(relation, head) projections W_k (scale-folded), each padded
                               to a full 128-lane tile -> all slices of feat_all are tile-aligned
    war_ref:  (D_in, 128)      column k = W_k @ ar_k (scale-folded); lanes >= K are zero
    wal_ref:  (K, D_in)        row    k = (W_k @ al_k)^T (scale-folded)
    bsum_ref: (1, 128)         pre-summed, head-mean-scaled bias row
    returns   (N, 128)         sum over relations, mean over heads (scale folded into weights),
                               optional ReLU; only the first d_out lanes are non-zero.
    """
    n = h.shape[0]
    num_rel = adj_ref.shape[0]
    k_total = wal_ref.shape[0]
    num_heads = k_total // num_rel

    # One lane-dense MXU pass for all (relation, head) value projections ...
    feat_all = jnp.dot(h, w_ref[...], preferred_element_type=jnp.float32)    # (N, K*128)
    # ... and two small MXU passes for ALL attention logits (fold of ar / al into W):
    #   e_r[v, k] = h[v] . (W_k ar_k)      -> dst scores, one column per block
    #   e_l[k, u] = h[u] . (W_k al_k)      -> src scores, one row per block (src on lanes)
    er_all = jnp.dot(h, war_ref[...], preferred_element_type=jnp.float32)    # (N, 128)
    el_all = lax.dot_general(wal_ref[...], h, (((1,), (1,)), ((), ())),
                             preferred_element_type=jnp.float32)             # (K, N)

    acc = jnp.zeros((n, LANE), dtype=jnp.float32)
    for r in range(num_rel):                 # static unroll (R == 2)
        adj = adj_ref[r]                     # (N, N)
        for hh in range(num_heads):          # static unroll (H == 2)
            k = r * num_heads + hh
            feat = feat_all[:, k * LANE:(k + 1) * LANE]      # (N, 128), tile-aligned slice
            z = er_all[:, k:k + 1] + el_all[k:k + 1, :]      # (N_dst, N_src)
            # Fused leaky_relu(0.2) + non-edge mask: one max + one select.
            # NOTE: zero in-degree rows would degenerate to a uniform softmax; DGL's GATConv
            # (allow_zero_in_degree=False) raises on such graphs, so no extra guard here.
            e = jnp.where(adj > 0, jnp.maximum(z, 0.2 * z), jnp.float32(-1e30))
            e = e - jnp.max(e, axis=-1, keepdims=True)       # edge_softmax (per dst row)
            p = jnp.exp(e)
            alpha = p * pl.reciprocal(jnp.sum(p, axis=-1, keepdims=True), approx=False)
            acc = acc + jnp.dot(alpha, feat, preferred_element_type=jnp.float32)
    acc = acc + bsum_ref[...]                # single hoisted bias add (head-mean pre-folded)
    if apply_relu:
        acc = jnp.maximum(acc, 0.0)
    return acc


def _rgat_fused_kernel(x_ref, adj_ref,
                       w1_ref, war1_ref, wal1_ref, b1_ref,
                       w2_ref, war2_ref, wal2_ref, b2_ref,
                       out_ref):
    """Whole RGATModel forward in one kernel; intermediates never touch HBM."""
    h1 = _gat_layer(x_ref[...], adj_ref, w1_ref, war1_ref, wal1_ref, b1_ref, apply_relu=True)
    # F.dropout(p=0.1, training=False) applied twice -> identity in eval mode.
    h2 = _gat_layer(h1, adj_ref, w2_ref, war2_ref, wal2_ref, b2_ref, apply_relu=False)
    out_ref[...] = h2                        # lane-dense (N, 128) store; wrapper slices to d


@jax.jit
def _rgat_forward_padded(x, adj, layer1, layer2):
    n = x.shape[0]
    return pl.pallas_call(
        _rgat_fused_kernel,
        out_shape=jax.ShapeDtypeStruct((n, LANE), jnp.float32),
        in_specs=[pl.BlockSpec(memory_space=pltpu.MemorySpace.VMEM)] * 10,
        out_specs=pl.BlockSpec(memory_space=pltpu.MemorySpace.VMEM),
    )(x, adj, *layer1, *layer2)


def rgat_forward(x, adj, layer1, layer2):
    """x: (N, D); adj: (R, N, N); layerX = packed (w, war, wal, bsum). Returns (N, D)."""
    d = x.shape[1]
    out_padded = _rgat_forward_padded(x, adj, layer1, layer2)
    return out_padded[:, :d]


def init_gat_layer(key, rel_names, d_in, d_out, num_heads):
    """Per-relation GATConv params (synthetic xavier-ish init, bias = 0 like DGL)."""
    params = {}
    for rel in rel_names:
        key, k1, k2, k3 = jax.random.split(key, 4)
        scale = jnp.sqrt(2.0) / jnp.sqrt(float(d_in + d_out))
        params[rel] = dict(
            w=jax.random.normal(k1, (num_heads, d_in, d_out), jnp.float32) * scale,
            al=jax.random.normal(k2, (num_heads, d_out), jnp.float32) * 0.1,
            ar=jax.random.normal(k3, (num_heads, d_out), jnp.float32) * 0.1,
            b=jnp.zeros((num_heads, d_out), jnp.float32),
        )
    return key, params


def pack_gat_layer(params, rel_names, num_heads, d_in_pad, *, in_scale, out_scale):
    """Pack per-(relation, head) GATConv params into lane-tile-aligned, scale-folded arrays.

    Folding (all host-side, mathematically exact):
      * attention vectors folded into the projection:  war_k = W_k @ ar_k,  wal_k = W_k @ al_k
      * `in_scale`  = scale of the activation the kernel layer RECEIVES relative to the true
        layer input (layer 2 receives H * h1_true because layer 1 skips its head-mean).
        Attention logits must be invariant to it -> war/wal scaled by 1/in_scale.
      * `out_scale` = scale of the activation the kernel layer EMITS relative to the true
        layer output (layer 1 emits H * h1_true; layer 2 emits the true output).
        Value path: w_pack = W * out_scale / (H * in_scale),  bsum = out_scale/H * sum_k b_k.
      w    -> (d_in_pad, K*128)   each block zero-padded to a 128-lane tile
      war  -> (d_in_pad, 128)     column k = folded W_k @ ar_k
      wal  -> (K, d_in_pad)       row    k = folded (W_k @ al_k)^T
      bsum -> (1, 128)            single pre-summed bias row
    """
    rel0 = params[rel_names[0]]
    d_in = rel0["w"].shape[1]
    d_out = rel0["w"].shape[2]
    k_total = len(rel_names) * num_heads
    w_p = np.zeros((d_in_pad, k_total * LANE), np.float32)
    war_p = np.zeros((d_in_pad, LANE), np.float32)
    wal_p = np.zeros((k_total, d_in_pad), np.float32)
    bsum_p = np.zeros((1, LANE), np.float32)
    w_scale = out_scale / (num_heads * in_scale)
    a_scale = 1.0 / in_scale
    b_scale = out_scale / num_heads
    k = 0
    for rel in rel_names:
        p = params[rel]
        for h in range(num_heads):
            w = np.asarray(p["w"][h])        # (d_in, d_out)
            al = np.asarray(p["al"][h])      # (d_out,)
            ar = np.asarray(p["ar"][h])      # (d_out,)
            b = np.asarray(p["b"][h])        # (d_out,)
            w_p[:d_in, k * LANE:k * LANE + d_out] = w * w_scale
            war_p[:d_in, k] = (w @ ar) * a_scale
            wal_p[k, :d_in] = (w @ al) * a_scale
            bsum_p[0, :d_out] += b * b_scale
            k += 1
    return (jnp.asarray(w_p), jnp.asarray(war_p), jnp.asarray(wal_p), jnp.asarray(bsum_p))


if __name__ == "__main__":
    N = 16
    D_MODEL = 32
    REL_NAMES = ("follows", "likes")

    key = jax.random.PRNGKey(0)
    key, kx = jax.random.split(key)
    x = jax.random.normal(kx, (N, D_MODEL), jnp.float32)

    # Synthetic hetero graph: one node type, two relations, dense 0/1 adjacency.
    # Self-loops guarantee in-degree >= 1 for every destination node.
    eye = jnp.eye(N, dtype=jnp.float32)
    adj_list = []
    for rel in REL_NAMES:
        key, ka = jax.random.split(key)
        rand_adj = (jax.random.uniform(ka, (N, N)) < 0.3).astype(jnp.float32)
        adj_list.append(jnp.maximum(rand_adj, eye))
    adj = jnp.stack(adj_list, axis=0)            # (R, N, N)

    key, conv1_params = init_gat_layer(key, REL_NAMES, D_MODEL, 2 * D_MODEL, NUM_HEADS)
    key, conv2_params = init_gat_layer(key, REL_NAMES, 2 * D_MODEL, D_MODEL, NUM_HEADS)
    # Layer 1 consumes the raw (N, D_MODEL) features, skips its 1/H head-mean (emits H*h1);
    # layer 2 consumes the padded (N, 128) activations and absorbs both 1/H factors in its
    # packed weights (ReLU commutes with the positive 1/H scale), emitting the true output.
    layer1 = pack_gat_layer(conv1_params, REL_NAMES, NUM_HEADS, d_in_pad=D_MODEL,
                            in_scale=1.0, out_scale=float(NUM_HEADS))
    layer2 = pack_gat_layer(conv2_params, REL_NAMES, NUM_HEADS, d_in_pad=LANE,
                            in_scale=float(NUM_HEADS), out_scale=1.0)

    out = rgat_forward(x, adj, layer1, layer2)   # corresponds to {"node": out}
    jax.block_until_ready(out)
    assert out.shape == (N, D_MODEL), out.shape
    assert bool(jnp.all(jnp.isfinite(out)))
    print("KERNEL_OK")
</pallas_src>

<mosaic_0001>
module attributes {stable_mosaic.version = 11 : i64} {
  func.func @_rgat_fused_kernel(%arg0: memref<16x32xf32, #tpu.memory_space<vmem>>, %arg1: memref<2x16x16xf32, #tpu.memory_space<vmem>>, %arg2: memref<32x512xf32, #tpu.memory_space<vmem>>, %arg3: memref<32x128xf32, #tpu.memory_space<vmem>>, %arg4: memref<4x32xf32, #tpu.memory_space<vmem>>, %arg5: memref<1x128xf32, #tpu.memory_space<vmem>>, %arg6: memref<128x512xf32, #tpu.memory_space<vmem>>, %arg7: memref<128x128xf32, #tpu.memory_space<vmem>>, %arg8: memref<4x128xf32, #tpu.memory_space<vmem>>, %arg9: memref<1x128xf32, #tpu.memory_space<vmem>>, %arg10: memref<16x128xf32, #tpu.memory_space<vmem>>) attributes {dimension_semantics = [], scalar_prefetch = 0 : i64, scratch_operands = 0 : i64, tpu.core_type = #tpu.core_type<tc>} {
    %c0 = arith.constant 0 : index
    %c0_0 = arith.constant 0 : index
    %0 = vector.load %arg0[%c0, %c0_0] : memref<16x32xf32, #tpu.memory_space<vmem>>, vector<16x32xf32>
    %c0_1 = arith.constant 0 : index
    %c0_2 = arith.constant 0 : index
    %1 = vector.load %arg2[%c0_1, %c0_2] : memref<32x512xf32, #tpu.memory_space<vmem>>, vector<32x512xf32>
    %cst = arith.constant dense<0.000000e+00> : vector<16x512xf32>
    %2 = tpu.matmul %0, %1, %cst {dimension_numbers = #tpu.dot_dimension_numbers<[1], [0], [0], [1], [0, 0, 1, 1], [], []>} : vector<16x32xf32>, vector<32x512xf32>, vector<16x512xf32> -> vector<16x512xf32>
    %c0_3 = arith.constant 0 : index
    %c0_4 = arith.constant 0 : index
    %3 = vector.load %arg3[%c0_3, %c0_4] : memref<32x128xf32, #tpu.memory_space<vmem>>, vector<32x128xf32>
    %cst_5 = arith.constant dense<0.000000e+00> : vector<16x128xf32>
    %4 = tpu.matmul %0, %3, %cst_5 {dimension_numbers = #tpu.dot_dimension_numbers<[1], [0], [0], [1], [0, 0, 1, 1], [], []>} : vector<16x32xf32>, vector<32x128xf32>, vector<16x128xf32> -> vector<16x128xf32>
    %c0_6 = arith.constant 0 : index
    %c0_7 = arith.constant 0 : index
    %5 = vector.load %arg4[%c0_6, %c0_7] : memref<4x32xf32, #tpu.memory_space<vmem>>, vector<4x32xf32>
    %cst_8 = arith.constant dense<0.000000e+00> : vector<4x16xf32>
    %6 = tpu.matmul %5, %0, %cst_8 {dimension_numbers = #tpu.dot_dimension_numbers<[1], [1], [0], [0], [0, 0, 1, 0], [], []>} : vector<4x32xf32>, vector<16x32xf32>, vector<4x16xf32> -> vector<4x16xf32>
    %cst_9 = arith.constant 0.000000e+00 : f32
    %7 = vector.broadcast %cst_9 : f32 to vector<16x128xf32>
    %c0_10 = arith.constant 0 : index
    %c0_11 = arith.constant 0 : index
    %c0_12 = arith.constant 0 : index
    %8 = vector.load %arg1[%c0_10, %c0_11, %c0_12] : memref<2x16x16xf32, #tpu.memory_space<vmem>>, vector<1x16x16xf32>
    %9 = vector.shape_cast %8 : vector<1x16x16xf32> to vector<16x16xf32>
    %10 = vector.extract_strided_slice %2 {offsets = [0, 0], sizes = [16, 128], strides = [1, 1]} : vector<16x512xf32> to vector<16x128xf32>
    %11 = vector.extract_strided_slice %4 {offsets = [0, 0], sizes = [16, 1], strides = [1, 1]} : vector<16x128xf32> to vector<16x1xf32>
    %12 = vector.extract_strided_slice %6 {offsets = [0, 0], sizes = [1, 16], strides = [1, 1]} : vector<4x16xf32> to vector<1x16xf32>
    %13 = vector.broadcast %11 : vector<16x1xf32> to vector<16x16xf32>
    %14 = vector.broadcast %12 : vector<1x16xf32> to vector<16x16xf32>
    %15 = arith.addf %13, %14 : vector<16x16xf32>
    %cst_13 = arith.constant 0.000000e+00 : f32
    %16 = vector.broadcast %cst_13 : f32 to vector<16x16xf32>
    %17 = arith.cmpf ogt, %9, %16 : vector<16x16xf32>
    %cst_14 = arith.constant 2.000000e-01 : f32
    %18 = vector.broadcast %cst_14 : f32 to vector<16x16xf32>
    %19 = arith.mulf %18, %15 : vector<16x16xf32>
    %20 = arith.maximumf %15, %19 : vector<16x16xf32>
    %cst_15 = arith.constant -1.000000e+30 : f32
    %21 = vector.broadcast %cst_15 : f32 to vector<16x16xf32>
    %22 = arith.select %17, %20, %21 : vector<16x16xi1>, vector<16x16xf32>
    %cst_16 = arith.constant dense<0xFF800000> : vector<16xf32>
    %23 = vector.multi_reduction <maximumf>, %22, %cst_16 [1] : vector<16x16xf32> to vector<16xf32>
    %24 = vector.shape_cast %23 : vector<16xf32> to vector<16x1xf32>
    %25 = vector.broadcast %24 : vector<16x1xf32> to vector<16x16xf32>
    %26 = arith.subf %22, %25 : vector<16x16xf32>
    %27 = math.exp %26 : vector<16x16xf32>
    %cst_17 = arith.constant dense<0.000000e+00> : vector<16xf32>
    %28 = vector.multi_reduction <add>, %27, %cst_17 [1] : vector<16x16xf32> to vector<16xf32>
    %29 = vector.shape_cast %28 : vector<16xf32> to vector<16x1xf32>
    %30 = tpu.reciprocal %29 : vector<16x1xf32> -> vector<16x1xf32>
    %31 = vector.broadcast %30 : vector<16x1xf32> to vector<16x16xf32>
    %32 = arith.mulf %27, %31 : vector<16x16xf32>
    %cst_18 = arith.constant dense<0.000000e+00> : vector<16x128xf32>
    %33 = tpu.matmul %32, %10, %cst_18 {dimension_numbers = #tpu.dot_dimension_numbers<[1], [0], [0], [1], [0, 0, 1, 1], [], []>} : vector<16x16xf32>, vector<16x128xf32>, vector<16x128xf32> -> vector<16x128xf32>
    %34 = arith.addf %7, %33 : vector<16x128xf32>
    %35 = vector.extract_strided_slice %2 {offsets = [0, 128], sizes = [16, 128], strides = [1, 1]} : vector<16x512xf32> to vector<16x128xf32>
    %36 = vector.extract_strided_slice %4 {offsets = [0, 1], sizes = [16, 1], strides = [1, 1]} : vector<16x128xf32> to vector<16x1xf32>
    %37 = vector.extract_strided_slice %6 {offsets = [1, 0], sizes = [1, 16], strides = [1, 1]} : vector<4x16xf32> to vector<1x16xf32>
    %38 = vector.broadcast %36 : vector<16x1xf32> to vector<16x16xf32>
    %39 = vector.broadcast %37 : vector<1x16xf32> to vector<16x16xf32>
    %40 = arith.addf %38, %39 : vector<16x16xf32>
    %cst_19 = arith.constant 0.000000e+00 : f32
    %41 = vector.broadcast %cst_19 : f32 to vector<16x16xf32>
    %42 = arith.cmpf ogt, %9, %41 : vector<16x16xf32>
    %cst_20 = arith.constant 2.000000e-01 : f32
    %43 = vector.broadcast %cst_20 : f32 to vector<16x16xf32>
    %44 = arith.mulf %43, %40 : vector<16x16xf32>
    %45 = arith.maximumf %40, %44 : vector<16x16xf32>
    %cst_21 = arith.constant -1.000000e+30 : f32
    %46 = vector.broadcast %cst_21 : f32 to vector<16x16xf32>
    %47 = arith.select %42, %45, %46 : vector<16x16xi1>, vector<16x16xf32>
    %cst_22 = arith.constant dense<0xFF800000> : vector<16xf32>
    %48 = vector.multi_reduction <maximumf>, %47, %cst_22 [1] : vector<16x16xf32> to vector<16xf32>
    %49 = vector.shape_cast %48 : vector<16xf32> to vector<16x1xf32>
    %50 = vector.broadcast %49 : vector<16x1xf32> to vector<16x16xf32>
    %51 = arith.subf %47, %50 : vector<16x16xf32>
    %52 = math.exp %51 : vector<16x16xf32>
    %cst_23 = arith.constant dense<0.000000e+00> : vector<16xf32>
    %53 = vector.multi_reduction <add>, %52, %cst_23 [1] : vector<16x16xf32> to vector<16xf32>
    %54 = vector.shape_cast %53 : vector<16xf32> to vector<16x1xf32>
    %55 = tpu.reciprocal %54 : vector<16x1xf32> -> vector<16x1xf32>
    %56 = vector.broadcast %55 : vector<16x1xf32> to vector<16x16xf32>
    %57 = arith.mulf %52, %56 : vector<16x16xf32>
    %cst_24 = arith.constant dense<0.000000e+00> : vector<16x128xf32>
    %58 = tpu.matmul %57, %35, %cst_24 {dimension_numbers = #tpu.dot_dimension_numbers<[1], [0], [0], [1], [0, 0, 1, 1], [], []>} : vector<16x16xf32>, vector<16x128xf32>, vector<16x128xf32> -> vector<16x128xf32>
    %59 = arith.addf %34, %58 : vector<16x128xf32>
    %c1 = arith.constant 1 : index
    %c0_25 = arith.constant 0 : index
    %c0_26 = arith.constant 0 : index
    %60 = vector.load %arg1[%c1, %c0_25, %c0_26] : memref<2x16x16xf32, #tpu.memory_space<vmem>>, vector<1x16x16xf32>
    %61 = vector.shape_cast %60 : vector<1x16x16xf32> to vector<16x16xf32>
    %62 = vector.extract_strided_slice %2 {offsets = [0, 256], sizes = [16, 128], strides = [1, 1]} : vector<16x512xf32> to vector<16x128xf32>
    %63 = vector.extract_strided_slice %4 {offsets = [0, 2], sizes = [16, 1], strides = [1, 1]} : vector<16x128xf32> to vector<16x1xf32>
    %64 = vector.extract_strided_slice %6 {offsets = [2, 0], sizes = [1, 16], strides = [1, 1]} : vector<4x16xf32> to vector<1x16xf32>
    %65 = vector.broadcast %63 : vector<16x1xf32> to vector<16x16xf32>
    %66 = vector.broadcast %64 : vector<1x16xf32> to vector<16x16xf32>
    %67 = arith.addf %65, %66 : vector<16x16xf32>
    %cst_27 = arith.constant 0.000000e+00 : f32
    %68 = vector.broadcast %cst_27 : f32 to vector<16x16xf32>
    %69 = arith.cmpf ogt, %61, %68 : vector<16x16xf32>
    %cst_28 = arith.constant 2.000000e-01 : f32
    %70 = vector.broadcast %cst_28 : f32 to vector<16x16xf32>
    %71 = arith.mulf %70, %67 : vector<16x16xf32>
    %72 = arith.maximumf %67, %71 : vector<16x16xf32>
    %cst_29 = arith.constant -1.000000e+30 : f32
    %73 = vector.broadcast %cst_29 : f32 to vector<16x16xf32>
    %74 = arith.select %69, %72, %73 : vector<16x16xi1>, vector<16x16xf32>
    %cst_30 = arith.constant dense<0xFF800000> : vector<16xf32>
    %75 = vector.multi_reduction <maximumf>, %74, %cst_30 [1] : vector<16x16xf32> to vector<16xf32>
    %76 = vector.shape_cast %75 : vector<16xf32> to vector<16x1xf32>
    %77 = vector.broadcast %76 : vector<16x1xf32> to vector<16x16xf32>
    %78 = arith.subf %74, %77 : vector<16x16xf32>
    %79 = math.exp %78 : vector<16x16xf32>
    %cst_31 = arith.constant dense<0.000000e+00> : vector<16xf32>
    %80 = vector.multi_reduction <add>, %79, %cst_31 [1] : vector<16x16xf32> to vector<16xf32>
    %81 = vector.shape_cast %80 : vector<16xf32> to vector<16x1xf32>
    %82 = tpu.reciprocal %81 : vector<16x1xf32> -> vector<16x1xf32>
    %83 = vector.broadcast %82 : vector<16x1xf32> to vector<16x16xf32>
    %84 = arith.mulf %79, %83 : vector<16x16xf32>
    %cst_32 = arith.constant dense<0.000000e+00> : vector<16x128xf32>
    %85 = tpu.matmul %84, %62, %cst_32 {dimension_numbers = #tpu.dot_dimension_numbers<[1], [0], [0], [1], [0, 0, 1, 1], [], []>} : vector<16x16xf32>, vector<16x128xf32>, vector<16x128xf32> -> vector<16x128xf32>
    %86 = arith.addf %59, %85 : vector<16x128xf32>
    %87 = vector.extract_strided_slice %2 {offsets = [0, 384], sizes = [16, 128], strides = [1, 1]} : vector<16x512xf32> to vector<16x128xf32>
    %88 = vector.extract_strided_slice %4 {offsets = [0, 3], sizes = [16, 1], strides = [1, 1]} : vector<16x128xf32> to vector<16x1xf32>
    %89 = vector.extract_strided_slice %6 {offsets = [3, 0], sizes = [1, 16], strides = [1, 1]} : vector<4x16xf32> to vector<1x16xf32>
    %90 = vector.broadcast %88 : vector<16x1xf32> to vector<16x16xf32>
    %91 = vector.broadcast %89 : vector<1x16xf32> to vector<16x16xf32>
    %92 = arith.addf %90, %91 : vector<16x16xf32>
    %cst_33 = arith.constant 0.000000e+00 : f32
    %93 = vector.broadcast %cst_33 : f32 to vector<16x16xf32>
    %94 = arith.cmpf ogt, %61, %93 : vector<16x16xf32>
    %cst_34 = arith.constant 2.000000e-01 : f32
    %95 = vector.broadcast %cst_34 : f32 to vector<16x16xf32>
    %96 = arith.mulf %95, %92 : vector<16x16xf32>
    %97 = arith.maximumf %92, %96 : vector<16x16xf32>
    %cst_35 = arith.constant -1.000000e+30 : f32
    %98 = vector.broadcast %cst_35 : f32 to vector<16x16xf32>
    %99 = arith.select %94, %97, %98 : vector<16x16xi1>, vector<16x16xf32>
    %cst_36 = arith.constant dense<0xFF800000> : vector<16xf32>
    %100 = vector.multi_reduction <maximumf>, %99, %cst_36 [1] : vector<16x16xf32> to vector<16xf32>
    %101 = vector.shape_cast %100 : vector<16xf32> to vector<16x1xf32>
    %102 = vector.broadcast %101 : vector<16x1xf32> to vector<16x16xf32>
    %103 = arith.subf %99, %102 : vector<16x16xf32>
    %104 = math.exp %103 : vector<16x16xf32>
    %cst_37 = arith.constant dense<0.000000e+00> : vector<16xf32>
    %105 = vector.multi_reduction <add>, %104, %cst_37 [1] : vector<16x16xf32> to vector<16xf32>
    %106 = vector.shape_cast %105 : vector<16xf32> to vector<16x1xf32>
    %107 = tpu.reciprocal %106 : vector<16x1xf32> -> vector<16x1xf32>
    %108 = vector.broadcast %107 : vector<16x1xf32> to vector<16x16xf32>
    %109 = arith.mulf %104, %108 : vector<16x16xf32>
    %cst_38 = arith.constant dense<0.000000e+00> : vector<16x128xf32>
    %110 = tpu.matmul %109, %87, %cst_38 {dimension_numbers = #tpu.dot_dimension_numbers<[1], [0], [0], [1], [0, 0, 1, 1], [], []>} : vector<16x16xf32>, vector<16x128xf32>, vector<16x128xf32> -> vector<16x128xf32>
    %111 = arith.addf %86, %110 : vector<16x128xf32>
    %c0_39 = arith.constant 0 : index
    %c0_40 = arith.constant 0 : index
    %112 = vector.load %arg5[%c0_39, %c0_40] : memref<1x128xf32, #tpu.memory_space<vmem>>, vector<1x128xf32>
    %113 = vector.broadcast %112 : vector<1x128xf32> to vector<16x128xf32>
    %114 = arith.addf %111, %113 : vector<16x128xf32>
    %cst_41 = arith.constant 0.000000e+00 : f32
    %115 = vector.broadcast %cst_41 : f32 to vector<16x128xf32>
    %116 = arith.maximumf %114, %115 : vector<16x128xf32>
    %c0_42 = arith.constant 0 : index
    %c0_43 = arith.constant 0 : index
    %117 = vector.load %arg6[%c0_42, %c0_43] : memref<128x512xf32, #tpu.memory_space<vmem>>, vector<128x512xf32>
    %cst_44 = arith.constant dense<0.000000e+00> : vector<16x512xf32>
    %118 = tpu.matmul %116, %117, %cst_44 {dimension_numbers = #tpu.dot_dimension_numbers<[1], [0], [0], [1], [0, 0, 1, 1], [], []>} : vector<16x128xf32>, vector<128x512xf32>, vector<16x512xf32> -> vector<16x512xf32>
    %c0_45 = arith.constant 0 : index
    %c0_46 = arith.constant 0 : index
    %119 = vector.load %arg7[%c0_45, %c0_46] : memref<128x128xf32, #tpu.memory_space<vmem>>, vector<128x128xf32>
    %cst_47 = arith.constant dense<0.000000e+00> : vector<16x128xf32>
    %120 = tpu.matmul %116, %119, %cst_47 {dimension_numbers = #tpu.dot_dimension_numbers<[1], [0], [0], [1], [0, 0, 1, 1], [], []>} : vector<16x128xf32>, vector<128x128xf32>, vector<16x128xf32> -> vector<16x128xf32>
    %c0_48 = arith.constant 0 : index
    %c0_49 = arith.constant 0 : index
    %121 = vector.load %arg8[%c0_48, %c0_49] : memref<4x128xf32, #tpu.memory_space<vmem>>, vector<4x128xf32>
    %cst_50 = arith.constant dense<0.000000e+00> : vector<4x16xf32>
    %122 = tpu.matmul %121, %116, %cst_50 {dimension_numbers = #tpu.dot_dimension_numbers<[1], [1], [0], [0], [0, 0, 1, 0], [], []>} : vector<4x128xf32>, vector<16x128xf32>, vector<4x16xf32> -> vector<4x16xf32>
    %cst_51 = arith.constant 0.000000e+00 : f32
    %123 = vector.broadcast %cst_51 : f32 to vector<16x128xf32>
    %c0_52 = arith.constant 0 : index
    %c0_53 = arith.constant 0 : index
    %c0_54 = arith.constant 0 : index
    %124 = vector.load %arg1[%c0_52, %c0_53, %c0_54] : memref<2x16x16xf32, #tpu.memory_space<vmem>>, vector<1x16x16xf32>
    %125 = vector.shape_cast %124 : vector<1x16x16xf32> to vector<16x16xf32>
    %126 = vector.extract_strided_slice %118 {offsets = [0, 0], sizes = [16, 128], strides = [1, 1]} : vector<16x512xf32> to vector<16x128xf32>
    %127 = vector.extract_strided_slice %120 {offsets = [0, 0], sizes = [16, 1], strides = [1, 1]} : vector<16x128xf32> to vector<16x1xf32>
    %128 = vector.extract_strided_slice %122 {offsets = [0, 0], sizes = [1, 16], strides = [1, 1]} : vector<4x16xf32> to vector<1x16xf32>
    %129 = vector.broadcast %127 : vector<16x1xf32> to vector<16x16xf32>
    %130 = vector.broadcast %128 : vector<1x16xf32> to vector<16x16xf32>
    %131 = arith.addf %129, %130 : vector<16x16xf32>
    %cst_55 = arith.constant 0.000000e+00 : f32
    %132 = vector.broadcast %cst_55 : f32 to vector<16x16xf32>
    %133 = arith.cmpf ogt, %125, %132 : vector<16x16xf32>
    %cst_56 = arith.constant 2.000000e-01 : f32
    %134 = vector.broadcast %cst_56 : f32 to vector<16x16xf32>
    %135 = arith.mulf %134, %131 : vector<16x16xf32>
    %136 = arith.maximumf %131, %135 : vector<16x16xf32>
    %cst_57 = arith.constant -1.000000e+30 : f32
    %137 = vector.broadcast %cst_57 : f32 to vector<16x16xf32>
    %138 = arith.select %133, %136, %137 : vector<16x16xi1>, vector<16x16xf32>
    %cst_58 = arith.constant dense<0xFF800000> : vector<16xf32>
    %139 = vector.multi_reduction <maximumf>, %138, %cst_58 [1] : vector<16x16xf32> to vector<16xf32>
    %140 = vector.shape_cast %139 : vector<16xf32> to vector<16x1xf32>
    %141 = vector.broadcast %140 : vector<16x1xf32> to vector<16x16xf32>
    %142 = arith.subf %138, %141 : vector<16x16xf32>
    %143 = math.exp %142 : vector<16x16xf32>
    %cst_59 = arith.constant dense<0.000000e+00> : vector<16xf32>
    %144 = vector.multi_reduction <add>, %143, %cst_59 [1] : vector<16x16xf32> to vector<16xf32>
    %145 = vector.shape_cast %144 : vector<16xf32> to vector<16x1xf32>
    %146 = tpu.reciprocal %145 : vector<16x1xf32> -> vector<16x1xf32>
    %147 = vector.broadcast %146 : vector<16x1xf32> to vector<16x16xf32>
    %148 = arith.mulf %143, %147 : vector<16x16xf32>
    %cst_60 = arith.constant dense<0.000000e+00> : vector<16x128xf32>
    %149 = tpu.matmul %148, %126, %cst_60 {dimension_numbers = #tpu.dot_dimension_numbers<[1], [0], [0], [1], [0, 0, 1, 1], [], []>} : vector<16x16xf32>, vector<16x128xf32>, vector<16x128xf32> -> vector<16x128xf32>
    %150 = arith.addf %123, %149 : vector<16x128xf32>
    %151 = vector.extract_strided_slice %118 {offsets = [0, 128], sizes = [16, 128], strides = [1, 1]} : vector<16x512xf32> to vector<16x128xf32>
    %152 = vector.extract_strided_slice %120 {offsets = [0, 1], sizes = [16, 1], strides = [1, 1]} : vector<16x128xf32> to vector<16x1xf32>
    %153 = vector.extract_strided_slice %122 {offsets = [1, 0], sizes = [1, 16], strides = [1, 1]} : vector<4x16xf32> to vector<1x16xf32>
    %154 = vector.broadcast %152 : vector<16x1xf32> to vector<16x16xf32>
    %155 = vector.broadcast %153 : vector<1x16xf32> to vector<16x16xf32>
    %156 = arith.addf %154, %155 : vector<16x16xf32>
    %cst_61 = arith.constant 0.000000e+00 : f32
    %157 = vector.broadcast %cst_61 : f32 to vector<16x16xf32>
    %158 = arith.cmpf ogt, %125, %157 : vector<16x16xf32>
    %cst_62 = arith.constant 2.000000e-01 : f32
    %159 = vector.broadcast %cst_62 : f32 to vector<16x16xf32>
    %160 = arith.mulf %159, %156 : vector<16x16xf32>
    %161 = arith.maximumf %156, %160 : vector<16x16xf32>
    %cst_63 = arith.constant -1.000000e+30 : f32
    %162 = vector.broadcast %cst_63 : f32 to vector<16x16xf32>
    %163 = arith.select %158, %161, %162 : vector<16x16xi1>, vector<16x16xf32>
    %cst_64 = arith.constant dense<0xFF800000> : vector<16xf32>
    %164 = vector.multi_reduction <maximumf>, %163, %cst_64 [1] : vector<16x16xf32> to vector<16xf32>
    %165 = vector.shape_cast %164 : vector<16xf32> to vector<16x1xf32>
    %166 = vector.broadcast %165 : vector<16x1xf32> to vector<16x16xf32>
    %167 = arith.subf %163, %166 : vector<16x16xf32>
    %168 = math.exp %167 : vector<16x16xf32>
    %cst_65 = arith.constant dense<0.000000e+00> : vector<16xf32>
    %169 = vector.multi_reduction <add>, %168, %cst_65 [1] : vector<16x16xf32> to vector<16xf32>
    %170 = vector.shape_cast %169 : vector<16xf32> to vector<16x1xf32>
    %171 = tpu.reciprocal %170 : vector<16x1xf32> -> vector<16x1xf32>
    %172 = vector.broadcast %171 : vector<16x1xf32> to vector<16x16xf32>
    %173 = arith.mulf %168, %172 : vector<16x16xf32>
    %cst_66 = arith.constant dense<0.000000e+00> : vector<16x128xf32>
    %174 = tpu.matmul %173, %151, %cst_66 {dimension_numbers = #tpu.dot_dimension_numbers<[1], [0], [0], [1], [0, 0, 1, 1], [], []>} : vector<16x16xf32>, vector<16x128xf32>, vector<16x128xf32> -> vector<16x128xf32>
    %175 = arith.addf %150, %174 : vector<16x128xf32>
    %c1_67 = arith.constant 1 : index
    %c0_68 = arith.constant 0 : index
    %c0_69 = arith.constant 0 : index
    %176 = vector.load %arg1[%c1_67, %c0_68, %c0_69] : memref<2x16x16xf32, #tpu.memory_space<vmem>>, vector<1x16x16xf32>
    %177 = vector.shape_cast %176 : vector<1x16x16xf32> to vector<16x16xf32>
    %178 = vector.extract_strided_slice %118 {offsets = [0, 256], sizes = [16, 128], strides = [1, 1]} : vector<16x512xf32> to vector<16x128xf32>
    %179 = vector.extract_strided_slice %120 {offsets = [0, 2], sizes = [16, 1], strides = [1, 1]} : vector<16x128xf32> to vector<16x1xf32>
    %180 = vector.extract_strided_slice %122 {offsets = [2, 0], sizes = [1, 16], strides = [1, 1]} : vector<4x16xf32> to vector<1x16xf32>
    %181 = vector.broadcast %179 : vector<16x1xf32> to vector<16x16xf32>
    %182 = vector.broadcast %180 : vector<1x16xf32> to vector<16x16xf32>
    %183 = arith.addf %181, %182 : vector<16x16xf32>
    %cst_70 = arith.constant 0.000000e+00 : f32
    %184 = vector.broadcast %cst_70 : f32 to vector<16x16xf32>
    %185 = arith.cmpf ogt, %177, %184 : vector<16x16xf32>
    %cst_71 = arith.constant 2.000000e-01 : f32
    %186 = vector.broadcast %cst_71 : f32 to vector<16x16xf32>
    %187 = arith.mulf %186, %183 : vector<16x16xf32>
    %188 = arith.maximumf %183, %187 : vector<16x16xf32>
    %cst_72 = arith.constant -1.000000e+30 : f32
    %189 = vector.broadcast %cst_72 : f32 to vector<16x16xf32>
    %190 = arith.select %185, %188, %189 : vector<16x16xi1>, vector<16x16xf32>
    %cst_73 = arith.constant dense<0xFF800000> : vector<16xf32>
    %191 = vector.multi_reduction <maximumf>, %190, %cst_73 [1] : vector<16x16xf32> to vector<16xf32>
    %192 = vector.shape_cast %191 : vector<16xf32> to vector<16x1xf32>
    %193 = vector.broadcast %192 : vector<16x1xf32> to vector<16x16xf32>
    %194 = arith.subf %190, %193 : vector<16x16xf32>
    %195 = math.exp %194 : vector<16x16xf32>
    %cst_74 = arith.constant dense<0.000000e+00> : vector<16xf32>
    %196 = vector.multi_reduction <add>, %195, %cst_74 [1] : vector<16x16xf32> to vector<16xf32>
    %197 = vector.shape_cast %196 : vector<16xf32> to vector<16x1xf32>
    %198 = tpu.reciprocal %197 : vector<16x1xf32> -> vector<16x1xf32>
    %199 = vector.broadcast %198 : vector<16x1xf32> to vector<16x16xf32>
    %200 = arith.mulf %195, %199 : vector<16x16xf32>
    %cst_75 = arith.constant dense<0.000000e+00> : vector<16x128xf32>
    %201 = tpu.matmul %200, %178, %cst_75 {dimension_numbers = #tpu.dot_dimension_numbers<[1], [0], [0], [1], [0, 0, 1, 1], [], []>} : vector<16x16xf32>, vector<16x128xf32>, vector<16x128xf32> -> vector<16x128xf32>
    %202 = arith.addf %175, %201 : vector<16x128xf32>
    %203 = vector.extract_strided_slice %118 {offsets = [0, 384], sizes = [16, 128], strides = [1, 1]} : vector<16x512xf32> to vector<16x128xf32>
    %204 = vector.extract_strided_slice %120 {offsets = [0, 3], sizes = [16, 1], strides = [1, 1]} : vector<16x128xf32> to vector<16x1xf32>
    %205 = vector.extract_strided_slice %122 {offsets = [3, 0], sizes = [1, 16], strides = [1, 1]} : vector<4x16xf32> to vector<1x16xf32>
    %206 = vector.broadcast %204 : vector<16x1xf32> to vector<16x16xf32>
    %207 = vector.broadcast %205 : vector<1x16xf32> to vector<16x16xf32>
    %208 = arith.addf %206, %207 : vector<16x16xf32>
    %cst_76 = arith.constant 0.000000e+00 : f32
    %209 = vector.broadcast %cst_76 : f32 to vector<16x16xf32>
    %210 = arith.cmpf ogt, %177, %209 : vector<16x16xf32>
    %cst_77 = arith.constant 2.000000e-01 : f32
    %211 = vector.broadcast %cst_77 : f32 to vector<16x16xf32>
    %212 = arith.mulf %211, %208 : vector<16x16xf32>
    %213 = arith.maximumf %208, %212 : vector<16x16xf32>
    %cst_78 = arith.constant -1.000000e+30 : f32
    %214 = vector.broadcast %cst_78 : f32 to vector<16x16xf32>
    %215 = arith.select %210, %213, %214 : vector<16x16xi1>, vector<16x16xf32>
    %cst_79 = arith.constant dense<0xFF800000> : vector<16xf32>
    %216 = vector.multi_reduction <maximumf>, %215, %cst_79 [1] : vector<16x16xf32> to vector<16xf32>
    %217 = vector.shape_cast %216 : vector<16xf32> to vector<16x1xf32>
    %218 = vector.broadcast %217 : vector<16x1xf32> to vector<16x16xf32>
    %219 = arith.subf %215, %218 : vector<16x16xf32>
    %220 = math.exp %219 : vector<16x16xf32>
    %cst_80 = arith.constant dense<0.000000e+00> : vector<16xf32>
    %221 = vector.multi_reduction <add>, %220, %cst_80 [1] : vector<16x16xf32> to vector<16xf32>
    %222 = vector.shape_cast %221 : vector<16xf32> to vector<16x1xf32>
    %223 = tpu.reciprocal %222 : vector<16x1xf32> -> vector<16x1xf32>
    %224 = vector.broadcast %223 : vector<16x1xf32> to vector<16x16xf32>
    %225 = arith.mulf %220, %224 : vector<16x16xf32>
    %cst_81 = arith.constant dense<0.000000e+00> : vector<16x128xf32>
    %226 = tpu.matmul %225, %203, %cst_81 {dimension_numbers = #tpu.dot_dimension_numbers<[1], [0], [0], [1], [0, 0, 1, 1], [], []>} : vector<16x16xf32>, vector<16x128xf32>, vector<16x128xf32> -> vector<16x128xf32>
    %227 = arith.addf %202, %226 : vector<16x128xf32>
    %c0_82 = arith.constant 0 : index
    %c0_83 = arith.constant 0 : index
    %228 = vector.load %arg9[%c0_82, %c0_83] : memref<1x128xf32, #tpu.memory_space<vmem>>, vector<1x128xf32>
    %229 = vector.broadcast %228 : vector<1x128xf32> to vector<16x128xf32>
    %230 = arith.addf %227, %229 : vector<16x128xf32>
    %c0_84 = arith.constant 0 : index
    %c0_85 = arith.constant 0 : index
    %231 = vector.load %arg10[%c0_84, %c0_85] : memref<16x128xf32, #tpu.memory_space<vmem>>, vector<16x128xf32>
    tpu.vector_store %arg10[%c0_84, %c0_85], %230 {strides = array<i32>} : memref<16x128xf32, #tpu.memory_space<vmem>>, vector<16x128xf32>,
    return
  }
}

</mosaic_0001>

<bundles_post_ra>
// kernel: _rgat_forward_padded.1
= control target key start
LH: loop header
LB: loop body
LE: loop exit
PB: predicated region body
PF: predicated region fallthrough
CT: control target
= control target key end

     0   :  { %15 = vsyncpa [#allocation3], 0  ;;  %s2188_s0 = inlined_call_operand.hbm [shape: f32[16,32], index: 0, kind: input, shape index: {}]   ;;  %s2189_s1 = inlined_call_operand.hbm [shape: f32[2,16,16], index: 1, kind: input, shape index: {}]   ;;  %s2190_s2 = inlined_call_operand.hbm [shape: f32[32,512], index: 2, kind: input, shape index: {}]   ;;  %s2191_s3 = inlined_call_operand.hbm [shape: f32[32,128], index: 3, kind: input, shape index: {}]   ;;  %s2192_s4 = inlined_call_operand.hbm [shape: f32[4,32], index: 4, kind: input, shape index: {}]   ;;  %s2193_s5 = inlined_call_operand.vmem [shape: f32[1,128], index: 5, kind: input, shape index: {}]   ;;  %s2194_s6 = inlined_call_operand.hbm [shape: f32[128,512], index: 6, kind: input, shape index: {}]   ;;  %s2195_s7 = inlined_call_operand.hbm [shape: f32[128,128], index: 7, kind: input, shape index: {}]   ;;  %s2196_s8 = inlined_call_operand.vmem [shape: f32[4,128], index: 8, kind: input, shape index: {}]   ;;  %s2197_s9 = inlined_call_operand.vmem [shape: f32[1,128], index: 9, kind: input, shape index: {}]   ;;  %s2198_s10 = inlined_call_operand.hbm [shape: f32[16,128], index: 10, kind: output, shape index: {}]  }
   0x1   :  { %16 = vsyncpa [#allocation6], 0 }
   0x2   :  { %17 = vsyncpa [#allocation9], 0 }
   0x3   :  { %18 = vsyncpa [#allocation12], 0 }
   0x4   :  { %19 = vsyncpa [#allocation4], 0  ;;  %s37_s15 = sshll.u32 %s2189_s1, 4  ;;  %s1669_s16 = smov [#allocation5]   ;;  %s38_s15 = int_to_ptr.hbm [resolvable:$true] %s37_s15 }
   0x5   :  { %s39_s17 = sshll.u32 %s1669_s16, 4  ;;  %s63_s20 = sshll.u32 %s2191_s3, 4  ;;  %s40_s17 = int_to_ptr.vmem [resolvable:$true] %s39_s17  ;;  %s64_s20 = int_to_ptr.hbm [resolvable:$true] %s63_s20 }
   0x6   :  { %s1670_s21 = smov 128   ;;  %s1671_s22 = smov 8  }
   0x7   :  { %45 = dma.hbm_to_vmem [thread:$0]  %s38_s15, 512, %s40_s17, [#allocation6], %s1670_s21, %s1670_s21, %s1671_s22  }
   0x8   :  { %s1672_s23 = smov [#allocation8]   ;;  %s89_s26 = sshll.u32 %s2194_s6, 4  ;;  %s90_s26 = int_to_ptr.hbm [resolvable:$true] %s89_s26 }
   0x9   :  { %s65_s24 = sshll.u32 %s1672_s23, 4  ;;  %s1673_s3 = smov [#allocation11]   ;;  %s66_s24 = int_to_ptr.vmem [resolvable:$true] %s65_s24 }
   0xa   :  { %71 = dma.hbm_to_vmem [thread:$0]  %s64_s20, 512, %s66_s24, [#allocation9], %s1670_s21, %s1670_s21, %s1671_s22  }
   0xb   :  { %s91_s27 = sshll.u32 %s1673_s3, 4  ;;  %s24_s30 = sshll.u32 %s2188_s0, 4  ;;  %s92_s27 = int_to_ptr.vmem [resolvable:$true] %s91_s27  ;;  %s25_s30 = int_to_ptr.hbm [resolvable:$true] %s24_s30 }
   0xc   :  { %s1674_s11 = smov 512   ;;  %s1675_s12 = smov 32  }
   0xd   :  { %97 = dma.hbm_to_vmem [thread:$0]  %s90_s26, 8192, %s92_s27, [#allocation12], %s1674_s11, %s1674_s11, %s1675_s12  }
   0xe   :  { %s1676_s13 = smov [#allocation2]   ;;  %s50_s17 = sshll.u32 %s2190_s2, 4  ;;  %s51_s17 = int_to_ptr.hbm [resolvable:$true] %s50_s17 }
   0xf   :  { %s26_s14 = sshll.u32 %s1676_s13, 4  ;;  %s77_s0 = sshll.u32 %s2192_s4, 4  ;;  %s27_s14 = int_to_ptr.vmem [resolvable:$true] %s26_s14  ;;  %s78_s0 = int_to_ptr.hbm [resolvable:$true] %s77_s0 }
  0x10   :  { %32 = dma.hbm_to_vmem [thread:$0]  %s25_s30, 256, %s27_s14, [#allocation3], %s1670_s21, %s1670_s21, %s1671_s22  }
  0x11   :  { %s1677_s19 = smov [#allocation7]   ;;  %s1678_s23 = smov [#allocation10]  }
  0x12   :  { %s52_s20 = sshll.u32 %s1677_s19, 4  ;;  %s79_s24 = sshll.u32 %s1678_s23, 4  ;;  %s53_s20 = int_to_ptr.vmem [resolvable:$true] %s52_s20  ;;  %s80_s24 = int_to_ptr.vmem [resolvable:$true] %s79_s24 }
  0x13   :  { %58 = dma.hbm_to_vmem [thread:$0]  %s51_s17, 2048, %s53_s20, [#allocation6], %s1674_s11, %s1674_s11, %s1675_s12  }
  0x14   :  { %s102_s2 = sshll.u32 %s2195_s7, 4  ;;  %s1679_s26 = smov [#allocation13]   ;;  %s103_s2 = int_to_ptr.hbm [resolvable:$true] %s102_s2 }
  0x15   :  { %82 = dma.hbm_to_vmem [thread:$0]  %s78_s0, 64, %s80_s24, [#allocation9]  }
  0x16   :  { %s104_s3 = sshll.u32 %s1679_s26, 4  ;;  %s105_s3 = int_to_ptr.vmem [resolvable:$true] %s104_s3 }
  0x17   :  { %110 = dma.hbm_to_vmem [thread:$0]  %s103_s2, 2048, %s105_s3, [#allocation12], %s1670_s21, %s1670_s21, %s1671_s22  }
  0x18   :  { %1659 = dma.done.wait [#allocation3], 256  }
  0x19   :  { %1660 = vsyncadd [#allocation3], 4294967040 }
  0x1a   :  { %1661 = dma.done.wait [#allocation6], 2560  }
  0x1b   :  { %1662 = vsyncadd [#allocation6], 4294964736 }
  0x1c   :  { %1663 = dma.done.wait [#allocation9], 576  }
  0x1d   :  { %1664 = vsyncadd [#allocation9], 4294966720 }
  0x1e   :  { %1665 = dma.done.wait [#allocation12], 10240  }
  0x1f   :  { %1666 = vsyncadd [#allocation12], 4294957056  ;;  %v157_v0 = vld [vmem:[#allocation7 + $0x60] sm:$0xff]  ;;  %v158_v3 = vld [vmem:[#allocation7 + $0x68] sm:$0xff]  ;;  %vm161_vm0 = vcmask 261120   ;;  %v1680_v19 = vmov 2  }
  0x20   :  { %v153_v1 = vld [vmem:[#allocation7 + $0x40] sm:$0xff]  ;;  %180 = vmatpush.msra.mxu0 %v157_v0  ;;  %v154_v4 = vld [vmem:[#allocation7 + $0x48] sm:$0xff]  ;;  %v1773_v6 = vld [vmem:[#allocation2] sm:$0xff]  ;;  %203 = vmatpush.msra.mxu1 %v158_v3  ;;  %v1681_v20 = vmov 0   ;;  %v1682_v25 = vmov 3   ;;  %v1683_v26 = vmov 1  }
  0x21   :  { %v149_v2 = vld [vmem:[#allocation7 + $0x20] sm:$0xff]  ;;  %1368 = vmatpush.msra.mxu3 %v158_v3  ;;  %v150_v7 = vld [vmem:[#allocation7 + $0x28] sm:$0xff]  ;;  %v263_v8 = vld [vmem:[#allocation8 + $0x18] sm:$0xff]  ;;  %1390 = vset.pattern.permute.xlu2 %v1680_v19  ;;  %vm334_vm2 = vcmask 130048   ;;  %s1684_s29 = smov [#allocation14]   ;;  %s1323_s13 = sshll.u32 %s2198_s10, 4  ;;  %s1324_s13 = int_to_ptr.hbm [resolvable:$true] %s1323_s13 }
  0x22   :  { %181 = vmatpush.msra.mxu0 %v153_v1  ;;  %v145_v5 = vld [vmem:[#allocation7] sm:$0xff]  ;;  %204 = vmatpush.msra.mxu1 %v154_v4  ;;  %v146_v9 = vld [vmem:[#allocation7 + $0x8] sm:$0xff]  ;;  %v262_v10 = vld [vmem:[#allocation8 + $0x10] sm:$0xff]  ;;  %s1321_s30 = sshll.u32 %s1684_s29, 4  ;;  %s1322_s30 = int_to_ptr.vmem [resolvable:$true] %s1321_s30 }
  0x23   :  { %1369 = vmatpush.msra.mxu3 %v154_v4  ;;  %v261_v11 = vld [vmem:[#allocation8 + $0x8] sm:$0xff]  ;;  %v1777_v12 = vld [vmem:[#allocation2 + $0x8] sm:$0xff]  ;;  %v260_v13 = vld [vmem:[#allocation8] sm:$0xff]  ;;  %1388 = vset.pattern.permute.xlu0 %v1681_v20 }
  0x24   :  { %182 = vmatpush.msra.mxu0 %v149_v2  ;;  %205 = vmatpush.msra.mxu1 %v150_v7  ;;  %v287_v14 = vld [vmem:[#allocation10] sm:$0xf]  ;;  %v160_v15 = vld [vmem:[#allocation7 + $0x78] sm:$0xff]  ;;  %v159_v27 = vld [vmem:[#allocation7 + $0x70] sm:$0xff] }
  0x25   :  { %1370 = vmatpush.msra.mxu3 %v150_v7  ;;  %v156_v16 = vld [vmem:[#allocation7 + $0x58] sm:$0xff]  ;;  %1392 = vset.pattern.permute.xlu1 %v1681_v20  ;;  %v155_v28 = vld [vmem:[#allocation7 + $0x50] sm:$0xff]  ;;  %v1812_v41 = vld [vmem:[#allocation5] sm:$0xff] }
  0x26   :  { %183 = vmatpush.msra.mxu0 %v145_v5  ;;  %206 = vmatpush.msra.mxu1 %v146_v9  ;;  %v152_v17 = vld [vmem:[#allocation7 + $0x38] sm:$0xff]  ;;  %v151_v29 = vld [vmem:[#allocation7 + $0x30] sm:$0xff]  ;;  %vm326_vm1 = vcmp.gt.f32.partialorder %v1812_v41, 0.0  ;;  %v1823_v56 = vld [vmem:[#allocation5 + $0x8] sm:$0xff] }
  0x27   :  { %1339 = vmatmul.msk.f32.vlgmr.msra.gmra.mxu0 %vm161_vm0, %v1773_v6  ;;  %1341 = vmatmul.msk.f32.vlgmr.msra.gmra.mxu1 %vm161_vm0, %v1773_v6  ;;  %v148_v18 = vld [vmem:[#allocation7 + $0x18] sm:$0xff]  ;;  %v147_v31 = vld [vmem:[#allocation7 + $0x10] sm:$0xff]  ;;  %vm327_vm4 = vcmp.gt.f32.partialorder %v1823_v56, 0.0 }
  0x28   :  { %276 = vmatpush.msrb.mxu0 %v263_v8  ;;  %1349 = vmatpush.xpose.msk.msrb.mxu1 %vm161_vm0, %v1777_v12  ;;  %v1815_v46 = vld [vmem:[#allocation5 + $0x10] sm:$0xff]  ;;  %v1828_v2 = vld [vmem:[#allocation5 + $0x18] sm:$0xff] }
  0x29   :  { %1371 = vmatpush.msra.mxu3 %v146_v9  ;;  %226 = vmatpush.msra.mxu2 %v159_v27  ;;  %vm520_vm3 = vcmp.gt.f32.partialorder %v1815_v46, 0.0  ;;  %vm521_vm5 = vcmp.gt.f32.partialorder %v1828_v2, 0.0 }
  0x2a   :  { %277 = vmatpush.msrb.mxu0 %v262_v10  ;;  %1342 = vmatmul.msk.f32.vlgmr.msra.gmra.mxu3 %vm161_vm0, %v1777_v12 }
  0x2b   :  { %249 = vmatpush.msrb.mxu3 %v160_v15  ;;  %227 = vmatpush.msra.mxu2 %v155_v28 }
  0x2c   :  { %278 = vmatpush.msrb.mxu0 %v261_v11  ;;  %1350 = vmatpush.xpose.msk.msrb.mxu1 %vm161_vm0, %v1773_v6 }
  0x2d   :  { %250 = vmatpush.msrb.mxu3 %v156_v16  ;;  %228 = vmatpush.msra.mxu2 %v151_v29 }
  0x2e   :  { %279 = vmatpush.msrb.mxu0 %v260_v13 }
  0x2f   :  { %1340 = vmatmul.msk.f32.gmra.mxu0 %vm161_vm0, %v1777_v12  ;;  %1351 = vmatmul.msk.f32.vlgmr.msrb.gmra.mxu1 %vm161_vm0, %v287_v14 }
  0x30   :  { %251 = vmatpush.msrb.mxu3 %v152_v17  ;;  %229 = vmatpush.msra.mxu2 %v147_v31 }
  0x31   :  { %1343 = vmatmul.msk.f32.vlgmr.msra.gmra.mxu2 %vm161_vm0, %v1773_v6 }
  0x32   :  { %252 = vmatpush.msrb.mxu3 %v148_v18 }
  0x33   :  { %1345 = vmatmul.msk.f32.vlgmr.msrb.gmra.mxu3 %vm161_vm0, %v1773_v6 }
  0x37   :  { %1347 = vmatmul.msk.f32.vlgmr.msrb.gmra.mxu0 %vm161_vm0, %v1773_v6 }
  0x39   :  { %1344 = vmatmul.msk.f32.gmra.mxu2 %vm161_vm0, %v1777_v12 }
  0x3b   :  { %1346 = vmatmul.msk.f32.gmra.mxu3 %vm161_vm0, %v1777_v12 }
  0x3f   :  { %1348 = vmatmul.msk.f32.gmra.mxu0 %vm161_vm0, %v1777_v12 }
  0xa4   :  { %v185_v21 = vpop.f32.mrf.mxu0  ;;  %v208_v32 = vpop.f32.mrf.mxu1 }
  0xac   :  { %v188_v22 = vpop.f32.mrf.mxu0  ;;  %v1808_v34 = vpop.f32.mrf.mxu1 }
  0xad   :  { %497 = vmatpush.msra.mxu3 %v188_v22  ;;  %v211_v30 = vpop.f32.mrf.mxu3  ;;  %v517_v35 = vperm.slane %v1808_v34, 2  ;;  %v323_v37 = vperm.slane %v1808_v34, 0  ;;  %v615_v47 = vperm.slane %v1808_v34, 3  ;;  %v391_v49 = vperm.slane %v1808_v34, 1 }
  0xae   :  { %468 = vmatpush.msrb.mxu2 %v211_v30 }
  0xaf   :  { %498 = vmatpush.msra.mxu3 %v185_v21 }
  0xb0   :  { %469 = vmatpush.msrb.mxu2 %v208_v32 }
  0xb4   :  { %v281_v23 = vpop.f32.mrf.mxu0 }
  0xb5   :  { %510 = vperm.xlu2 %1390, %v281_v23   ;;  %315 = vperm.xlu0 %1388, %v281_v23  }
  0xbc   :  { %v284_v24 = vpop.f32.mrf.mxu0 }
  0xbd   :  { %1391 = vset.pattern.permute.xlu2 %v1682_v25  ;;  %1389 = vset.pattern.permute.xlu0 %v1683_v26 }
  0xbe   :  { %320 = vperm.xlu1 %1392, %v284_v24   ;;  %608 = vperm.xlu2 %1391, %v281_v23  }
  0xbf   :  { %384 = vperm.xlu0 %1389, %v281_v23  }
  0xc6   :  { %1393 = vset.pattern.permute.xlu1 %v1683_v26  ;;  %612 = vperm.xlu2 %1391, %v284_v24  }
  0xc7   :  { %388 = vperm.xlu1 %1393, %v284_v24  }
  0xce   :  { %1397 = vset.pattern.permute.xlu2 %v1683_v26 }
  0xcf   :  { %1394 = vset.pattern.permute.xlu1 %v1680_v19 }
  0xd0   :  { %514 = vperm.xlu1 %1394, %v284_v24  }
  0xd8   :  { %1395 = vset.pattern.permute.xlu1 %v1681_v20 }
 0x10f   :  { %v511_v33 = vpop.permute.xlu2 %510 }
 0x110   :  { %v518_v38 = vadd.f32 %v517_v35, %v511_v33 }
 0x112   :  { %v522_v43 = vmul.f32 0.2, %v518_v38 }
 0x114   :  { %v524_v50 = vmax.f32 %v518_v38, %v522_v43 }
 0x116   :  { %v526_v60 = vsel %vm520_vm3, %v524_v50, -1e+30 }
 0x117   :  { %v528_v3 = vsel %vm334_vm2, %v526_v60, -inf }
 0x118   :  { %v609_v36 = vpop.permute.xlu2 %608 }
 0x119   :  { %v616_v57 = vadd.f32 %v615_v47, %v609_v36 }
 0x11b   :  { %v618_v0 = vmul.f32 0.2, %v616_v57 }
 0x11d   :  { %v620_v10 = vmax.f32 %v616_v57, %v618_v0 }
 0x11f   :  { %v622_v15 = vsel %vm520_vm3, %v620_v10, -1e+30  ;;  %v231_v10 = vpop.f32.mrf.mxu2 }
 0x120   :  { %v613_v45 = vpop.permute.xlu2 %612  ;;  %v624_v18 = vsel %vm334_vm2, %v622_v15, -inf }
 0x121   :  { %v617_v52 = vadd.f32 %v615_v47, %v613_v45 }
 0x123   :  { %v619_v61 = vmul.f32 0.2, %v617_v52 }
 0x125   :  { %v621_v5 = vmax.f32 %v617_v52, %v619_v61 }
 0x127   :  { %v316_v39 = vpop.permute.xlu0 %315  ;;  %v623_v13 = vsel %vm521_vm5, %v621_v5, -1e+30 }
 0x128   :  { %v324_v40 = vadd.f32 %v323_v37, %v316_v39  ;;  %v627_v16 = vsel %vm334_vm2, %v623_v13, -inf }
 0x12a   :  { %v328_v42 = vmul.f32 0.2, %v324_v40 }
 0x12c   :  { %v330_v44 = vmax.f32 %v324_v40, %v328_v42 }
 0x12e   :  { %v332_v48 = vsel %vm326_vm1, %v330_v44, -1e+30 }
 0x12f   :  { %v335_v51 = vsel %vm334_vm2, %v332_v48, -inf }
 0x130   :  { %v321_v53 = vpop.permute.xlu1 %320  ;;  %336 = vmax.xlane.f32.xlu0 %v335_v51 }
 0x131   :  { %v325_v54 = vadd.f32 %v323_v37, %v321_v53  ;;  %v385_v55 = vpop.permute.xlu0 %384 }
 0x132   :  { %v392_v58 = vadd.f32 %v391_v49, %v385_v55 }
 0x133   :  { %v329_v59 = vmul.f32 0.2, %v325_v54 }
 0x134   :  { %v394_v62 = vmul.f32 0.2, %v392_v58 }
 0x135   :  { %v331_v63 = vmax.f32 %v325_v54, %v329_v59 }
 0x136   :  { %v396_v1 = vmax.f32 %v392_v58, %v394_v62 }
 0x137   :  { %v333_v4 = vsel %vm327_vm4, %v331_v63, -1e+30 }
 0x138   :  { %529 = vmax.xlane.f32.xlu0 %v528_v3  ;;  %v338_v6 = vsel %vm334_vm2, %v333_v4, -inf  ;;  %v398_v7 = vsel %vm326_vm1, %v396_v1, -1e+30 }
 0x139   :  { %339 = vmax.xlane.f32.xlu2 %v338_v6  ;;  %v389_v8 = vpop.permute.xlu1 %388  ;;  %v400_v9 = vsel %vm334_vm2, %v398_v7, -inf }
 0x13a   :  { %v393_v11 = vadd.f32 %v391_v49, %v389_v8  ;;  %401 = vmax.xlane.f32.xlu1 %v400_v9  ;;  %v254_v9 = vpop.f32.mrf.mxu3 }
 0x13c   :  { %v395_v12 = vmul.f32 0.2, %v393_v11 }
 0x13e   :  { %v397_v14 = vmax.f32 %v393_v11, %v395_v12  ;;  %v234_v12 = vpop.f32.mrf.mxu2 }
 0x13f   :  { %596 = vmatpush.msra.mxu1 %v234_v12 }
 0x140   :  { %628 = vmax.xlane.f32.xlu0 %v627_v16  ;;  %v399_v17 = vsel %vm327_vm4, %v397_v14, -1e+30 }
 0x141   :  { %v403_v21 = vsel %vm334_vm2, %v399_v17, -inf  ;;  %597 = vmatpush.msra.mxu1 %v231_v10  ;;  %v761_v10 = vld [vmem:[#allocation11 + $0x190] sm:$0xff] }
 0x142   :  { %625 = vmax.xlane.f32.xlu1 %v624_v18  ;;  %404 = vmax.xlane.f32.xlu2 %v403_v21  ;;  %v515_v22 = vpop.permute.xlu1 %514  ;;  %v257_v11 = vpop.f32.mrf.mxu3 }
 0x143   :  { %v519_v23 = vadd.f32 %v517_v35, %v515_v22  ;;  %692 = vmatpush.msra.mxu0 %v257_v11  ;;  %v762_v11 = vld [vmem:[#allocation11 + $0x198] sm:$0xff] }
 0x145   :  { %v523_v24 = vmul.f32 0.2, %v519_v23  ;;  %693 = vmatpush.msra.mxu0 %v254_v9  ;;  %v751_v9 = vld [vmem:[#allocation11 + $0x140] sm:$0xff] }
 0x147   :  { %v525_v26 = vmax.f32 %v519_v23, %v523_v24 }
 0x149   :  { %v527_v27 = vsel %vm521_vm5, %v525_v26, -1e+30 }
 0x14a   :  { %v531_v28 = vsel %vm334_vm2, %v527_v27, -inf }
 0x14b   :  { %532 = vmax.xlane.f32.xlu2 %v531_v28  ;;  %v767_v28 = vld [vmem:[#allocation11 + $0x1c0] sm:$0xff] }
 0x1a3   :  { %v337_v29 = vpop.xlane.xlu0 %336 }
 0x1a4   :  { %v341_v30 = vsub.f32 %v332_v48, %v337_v29 }
 0x1a6   :  { %v343_v31 = vmul.f32 1.442695, %v341_v30 }
 0x1a8   :  { %1403 = vpow2.f32 %v343_v31 }
 0x1ab   :  { %v530_v32 = vpop.xlane.xlu0 %529 }
 0x1ac   :  { %v340_v33 = vpop.xlane.xlu2 %339  ;;  %v534_v35 = vsub.f32 %v526_v60, %v530_v32 }
 0x1ad   :  { %v342_v34 = vsub.f32 %v333_v4, %v340_v33  ;;  %v402_v36 = vpop.xlane.xlu1 %401 }
 0x1ae   :  { %v1850_v37 = vpop.eup %1403  ;;  %v406_v38 = vsub.f32 %v398_v7, %v402_v36  ;;  %v536_v43 = vmul.f32 1.442695, %v534_v35  ;;  %v772_v36 = vld [vmem:[#allocation11 + $0x1e8] sm:$0xff] }
 0x1af   :  { %v345_v39 = vmul.f32 1.442695, %v342_v34  ;;  %v347_v40 = vsel %vm334_vm2, %v1850_v37, 0.0  ;;  %v763_v34 = vld [vmem:[#allocation11 + $0x1a0] sm:$0xff]  ;;  %798 = vmatpush.msrb.mxu3 %v772_v36  ;;  %v753_v36 = vld [vmem:[#allocation11 + $0x150] sm:$0xff] }
 0x1b0   :  { %v408_v42 = vmul.f32 1.442695, %v406_v38  ;;  %348 = vadd.xlane.f32.xlu1 %v347_v40 }
 0x1b1   :  { %1405 = vpow2.f32 %v345_v39 }
 0x1b2   :  { %1407 = vpow2.f32 %v408_v42  ;;  %v773_v42 = vld [vmem:[#allocation11 + $0x1f0] sm:$0xff] }
 0x1b3   :  { %v629_v44 = vpop.xlane.xlu0 %628  ;;  %1409 = vpow2.f32 %v536_v43  ;;  %v774_v43 = vld [vmem:[#allocation11 + $0x1f8] sm:$0xff]  ;;  %821 = vmatpush.msrb.mxu1 %v773_v42 }
 0x1b4   :  { %v631_v52 = vsub.f32 %v623_v13, %v629_v44  ;;  %844 = vmatpush.msrb.mxu0 %v774_v43  ;;  %v743_v43 = vld [vmem:[#allocation11 + $0x100] sm:$0xff] }
 0x1b5   :  { %v405_v45 = vpop.xlane.xlu2 %404  ;;  %v626_v47 = vpop.xlane.xlu1 %625 }
 0x1b6   :  { %v407_v48 = vsub.f32 %v399_v17, %v405_v45  ;;  %v630_v49 = vsub.f32 %v622_v15, %v626_v47  ;;  %v634_v58 = vmul.f32 1.442695, %v631_v52  ;;  %v759_v47 = vld [vmem:[#allocation11 + $0x180] sm:$0xff] }
 0x1b7   :  { %v1854_v50 = vpop.eup %1405 }
 0x1b8   :  { %v1856_v51 = vpop.eup %1407  ;;  %v410_v53 = vmul.f32 1.442695, %v407_v48  ;;  %v632_v54 = vmul.f32 1.442695, %v630_v49  ;;  %v350_v55 = vsel %vm334_vm2, %v1854_v50, 0.0  ;;  %v768_v48 = vld [vmem:[#allocation11 + $0x1c8] sm:$0xff] }
 0x1b9   :  { %351 = vadd.xlane.f32.xlu0 %v350_v55  ;;  %v412_v57 = vsel %vm334_vm2, %v1856_v51, 0.0  ;;  %v1862_v59 = vpop.eup %1409  ;;  %799 = vmatpush.msrb.mxu3 %v768_v48 }
 0x1ba   :  { %1411 = vpow2.f32 %v410_v53  ;;  %413 = vadd.xlane.f32.xlu2 %v412_v57  ;;  %v540_v3 = vsel %vm334_vm2, %v1862_v59, 0.0 }
 0x1bb   :  { %1413 = vpow2.f32 %v632_v54  ;;  %v770_v54 = vld [vmem:[#allocation11 + $0x1d8] sm:$0xff] }
 0x1bc   :  { %1415 = vpow2.f32 %v634_v58  ;;  %845 = vmatpush.msrb.mxu0 %v770_v54 }
 0x1be   :  { %v533_v60 = vpop.xlane.xlu2 %532 }
 0x1bf   :  { %v535_v61 = vsub.f32 %v527_v27, %v533_v60  ;;  %v771_v27 = vld [vmem:[#allocation11 + $0x1e0] sm:$0xff] }
 0x1c0   :  { %v1864_v62 = vpop.eup %1411  ;;  %775 = vmatpush.msra.mxu2 %v771_v27  ;;  %v755_v60 = vld [vmem:[#allocation11 + $0x160] sm:$0xff]  ;;  %v758_v27 = vld [vmem:[#allocation11 + $0x178] sm:$0xff] }
 0x1c1   :  { %v1866_v63 = vpop.eup %1413  ;;  %v538_v0 = vmul.f32 1.442695, %v535_v61  ;;  %v415_v1 = vsel %vm334_vm2, %v1864_v62, 0.0  ;;  %v764_v61 = vld [vmem:[#allocation11 + $0x1a8] sm:$0xff] }
 0x1c2   :  { %416 = vadd.xlane.f32.xlu1 %v415_v1  ;;  %541 = vadd.xlane.f32.xlu2 %v540_v3  ;;  %v636_v4 = vsel %vm334_vm2, %v1866_v63, 0.0  ;;  %v1874_v5 = vpop.eup %1415  ;;  %v766_v3 = vld [vmem:[#allocation11 + $0x1b8] sm:$0xff] }
 0x1c3   :  { %1417 = vpow2.f32 %v538_v0  ;;  %637 = vadd.xlane.f32.xlu0 %v636_v4  ;;  %v639_v7 = vsel %vm334_vm2, %v1874_v5, 0.0  ;;  %776 = vmatpush.msra.mxu2 %v767_v28  ;;  %v765_v0 = vld [vmem:[#allocation11 + $0x1b0] sm:$0xff]  ;;  %v760_v4 = vld [vmem:[#allocation11 + $0x188] sm:$0xff] }
 0x1c4   :  { %800 = vmatpush.msrb.mxu3 %v764_v61  ;;  %846 = vmatpush.msrb.mxu0 %v766_v3 }
 0x1c5   :  { %777 = vmatpush.msra.mxu2 %v763_v34  ;;  %v752_v34 = vld [vmem:[#allocation11 + $0x148] sm:$0xff] }
 0x1c6   :  { %801 = vmatpush.msrb.mxu3 %v760_v4  ;;  %847 = vmatpush.msrb.mxu0 %v762_v11  ;;  %v731_v11 = vld [vmem:[#allocation11 + $0xa0] sm:$0xff]  ;;  %v881_v4 = vld [vmem:[#allocation13 + $0x70] sm:$0xff] }
 0x1c7   :  { %778 = vmatpush.msra.mxu2 %v759_v47 }
 0x1c8   :  { %848 = vmatpush.msrb.mxu0 %v758_v27 }
 0x1c9   :  { %v1876_v6 = vpop.eup %1417  ;;  %779 = vmatpush.msra.mxu2 %v755_v60 }
 0x1ca   :  { %640 = vadd.xlane.f32.xlu2 %v639_v7  ;;  %v543_v8 = vsel %vm334_vm2, %v1876_v6, 0.0 }
 0x1cb   :  { %544 = vadd.xlane.f32.xlu1 %v543_v8  ;;  %780 = vmatpush.msra.mxu2 %v751_v9 }
 0x223   :  { %v349_v13 = vpop.xlane.xlu1 %348 }
 0x224   :  { %1419 = vrcp.f32 %v349_v13  ;;  %v364_v21 = vand.u32 2147483648, %v349_v13  ;;  %v362_v23 = vand.u32 2147483647, %v349_v13  ;;  %vm358_vm7 = vweird.f32 %v349_v13 }
 0x226   :  { %v365_v26 = vor.u32 1.1754944e-38, %v364_v21  ;;  %vm363_vm9 = vcmp.eq.f32.partialorder %v362_v23, 8.507059e+37 }
 0x22a   :  { %v1420_v14 = vpop.eup %1419 }
 0x22b   :  { %v354_v15 = vmul.f32 %v1420_v14, %v349_v13  ;;  %vm359_vm6 = vweird.f32 %v1420_v14 }
 0x22c   :  { %v1882_v16 = vpop.xlane.xlu0 %351  ;;  %vm360_vm8 = vmor %vm358_vm7, %vm359_vm6 }
 0x22d   :  { %v355_v17 = vsub.f32 1.0, %v354_v15  ;;  %1421 = vrcp.f32 %v1882_v16  ;;  %v1885_v18 = vpop.xlane.xlu2 %413  ;;  %v378_v49 = vand.u32 2147483648, %v1882_v16  ;;  %v376_v58 = vand.u32 2147483647, %v1882_v16 }
 0x22e   :  { %1423 = vrcp.f32 %v1885_v18  ;;  %v427_v53 = vand.u32 2147483647, %v1885_v18  ;;  %v429_v57 = vand.u32 2147483648, %v1885_v18  ;;  %vm372_vm11 = vweird.f32 %v1882_v16 }
 0x22f   :  { %v356_v22 = vmul.f32 %v1420_v14, %v355_v17  ;;  %v379_v12 = vor.u32 1.1754944e-38, %v378_v49  ;;  %vm423_vm13 = vweird.f32 %v1885_v18  ;;  %v757_v17 = vld [vmem:[#allocation11 + $0x170] sm:$0xff]  ;;  %vm377_vm0 = vcmp.eq.f32.partialorder %v376_v58, 8.507059e+37 }
 0x230   :  { %vm1920_vm14 = vcmp.eq.f32.partialorder %v427_v53, 8.507059e+37 }
 0x231   :  { %v357_v24 = vadd.f32 %v1420_v14, %v356_v22  ;;  %v430_v22 = vor.u32 1.1754944e-38, %v429_v57 }
 0x233   :  { %v1888_v29 = vpop.eup %1421  ;;  %v361_v30 = vsel %vm360_vm8, %v1420_v14, %v357_v24 }
 0x234   :  { %v1890_v31 = vpop.eup %1423  ;;  %v366_v32 = vsel %vm363_vm9, %v365_v26, %v361_v30  ;;  %v368_v33 = vmul.f32 %v1888_v29, %v1882_v16  ;;  %vm373_vm10 = vweird.f32 %v1888_v29  ;;  %v756_v16 = vld [vmem:[#allocation11 + $0x168] sm:$0xff]  ;;  %v747_v26 = vld [vmem:[#allocation11 + $0x120] sm:$0xff] }
 0x235   :  { %v419_v38 = vmul.f32 %v1890_v31, %v1885_v18  ;;  %v1896_v35 = vpop.xlane.xlu2 %541  ;;  %v1898_v39 = vpop.xlane.xlu1 %416  ;;  %v381_v40 = vmul.f32 %v1850_v37, %v366_v32  ;;  %v769_v37 = vld [vmem:[#allocation11 + $0x1d0] sm:$0xff]  ;;  %vm424_vm12 = vweird.f32 %v1890_v31  ;;  %vm1926_vm15 = vmor %vm372_vm11, %vm373_vm10  ;;  %802 = vmatpush.msrb.mxu3 %v756_v16  ;;  %781 = vmatpush.msra.mxu2 %v747_v26 }
 0x236   :  { %v369_v44 = vsub.f32 1.0, %v368_v33  ;;  %1425 = vrcp.f32 %v1896_v35  ;;  %v1902_v45 = vpop.xlane.xlu0 %637  ;;  %822 = vmatpush.msrb.mxu1 %v769_v37  ;;  %v555_v7 = vand.u32 2147483647, %v1896_v35  ;;  %v557_v23 = vand.u32 2147483648, %v1896_v35  ;;  %vm1942_vm6 = vmor %vm423_vm13, %vm424_vm12 }
 0x237   :  { %v420_v52 = vsub.f32 1.0, %v419_v38  ;;  %1427 = vrcp.f32 %v1902_v45  ;;  %1354 = vmatmul.msk.f32.vlgmr.msra.gmra.mxu3 %vm334_vm2, %v381_v40  ;;  %vm551_vm7 = vweird.f32 %v1896_v35  ;;  %vm647_vm8 = vweird.f32 %v1902_v45  ;;  %782 = vmatpush.msra.mxu2 %v743_v43 }
 0x238   :  { %v370_v55 = vmul.f32 %v1888_v29, %v369_v44  ;;  %1429 = vrcp.f32 %v1898_v39  ;;  %823 = vmatpush.msrb.mxu1 %v765_v0  ;;  %vm1952_vm9 = vcmp.eq.f32.partialorder %v555_v7, 8.507059e+37  ;;  %v754_v44 = vld [vmem:[#allocation11 + $0x158] sm:$0xff]  ;;  %v651_v49 = vand.u32 2147483647, %v1902_v45  ;;  %803 = vmatpush.msrb.mxu3 %v752_v34 }
 0x239   :  { %v421_v1 = vmul.f32 %v1890_v31, %v420_v52  ;;  %v653_v52 = vand.u32 2147483648, %v1902_v45  ;;  %v558_v53 = vor.u32 1.1754944e-38, %v557_v23  ;;  %v443_v58 = vand.u32 2147483648, %v1898_v39  ;;  %849 = vmatpush.msrb.mxu0 %v754_v44  ;;  %v727_v23 = vld [vmem:[#allocation11 + $0x80] sm:$0xff] }
 0x23a   :  { %v371_v8 = vadd.f32 %v1888_v29, %v370_v55  ;;  %824 = vmatpush.msrb.mxu1 %v761_v10  ;;  %v739_v55 = vld [vmem:[#allocation11 + $0xe0] sm:$0xff]  ;;  %vm1982_vm12 = vcmp.eq.f32.partialorder %v651_v49, 8.507059e+37  ;;  %vm437_vm13 = vweird.f32 %v1898_v39  ;;  %v441_v10 = vand.u32 2147483647, %v1898_v39 }
 0x23b   :  { %v422_v13 = vadd.f32 %v1890_v31, %v421_v1  ;;  %v735_v1 = vld [vmem:[#allocation11 + $0xc0] sm:$0xff]  ;;  %v654_v7 = vor.u32 1.1754944e-38, %v653_v52  ;;  %783 = vmatpush.msra.mxu2 %v739_v55  ;;  %v744_v55 = vld [vmem:[#allocation11 + $0x108] sm:$0xff] }
 0x23c   :  { %v1930_v21 = vpop.eup %1425  ;;  %v375_v24 = vsel %vm1926_vm15, %v1888_v29, %v371_v8  ;;  %825 = vmatpush.msrb.mxu1 %v757_v17 }
 0x23d   :  { %v1936_v28 = vpop.eup %1427  ;;  %v547_v32 = vmul.f32 %v1930_v21, %v1896_v35  ;;  %v1950_v29 = vpop.xlane.xlu2 %640  ;;  %v380_v33 = vsel %vm377_vm0, %v379_v12, %v375_v24  ;;  %v426_v42 = vsel %vm1942_vm6, %v1890_v31, %v422_v13  ;;  %vm552_vm10 = vweird.f32 %v1930_v21  ;;  %784 = vmatpush.msra.mxu2 %v735_v1  ;;  %v737_v1 = vld [vmem:[#allocation11 + $0xd0] sm:$0xff] }
 0x23e   :  { %v643_v38 = vmul.f32 %v1936_v28, %v1902_v45  ;;  %1431 = vrcp.f32 %v1950_v29  ;;  %v1959_v40 = vpop.xlane.xlu1 %544  ;;  %v1964_v47 = vpop.eup %1429  ;;  %v382_v54 = vmul.f32 %v1854_v50, %v380_v33  ;;  %826 = vmatpush.msrb.mxu1 %v753_v36  ;;  %v431_v60 = vsel %vm1920_vm14, %v430_v22, %v426_v42  ;;  %vm553_vm14 = vmor %vm551_vm7, %vm552_vm10  ;;  %v723_v33 = vld [vmem:[#allocation11 + $0x60] sm:$0xff] }
 0x23f   :  { %v548_v48 = vsub.f32 1.0, %v547_v32  ;;  %1433 = vrcp.f32 %v1959_v40  ;;  %v433_v31 = vmul.f32 %v1964_v47, %v1898_v39  ;;  %vm648_vm11 = vweird.f32 %v1936_v28  ;;  %785 = vmatpush.msra.mxu2 %v731_v11  ;;  %v729_v11 = vld [vmem:[#allocation11 + $0x90] sm:$0xff] }
 0x240   :  { %v644_v37 = vsub.f32 1.0, %v643_v38  ;;  %1355 = vmatmul.msk.f32.gmra.mxu3 %vm334_vm2, %v382_v54  ;;  %v446_v50 = vmul.f32 %v1856_v51, %v431_v60  ;;  %vm438_vm15 = vweird.f32 %v1964_v47  ;;  %vm649_vm0 = vmor %vm647_vm8, %vm648_vm11  ;;  %v444_v35 = vor.u32 1.1754944e-38, %v443_v58  ;;  %v715_v54 = vld [vmem:[#allocation11 + $0x20] sm:$0xff]  ;;  %v746_v58 = vld [vmem:[#allocation11 + $0x118] sm:$0xff] }
 0x241   :  { %v549_v57 = vmul.f32 %v1930_v21, %v548_v48  ;;  %v434_v0 = vsub.f32 1.0, %v433_v31  ;;  %v667_v15 = vand.u32 2147483648, %v1950_v29  ;;  %v571_v26 = vand.u32 2147483648, %v1959_v40  ;;  %vm439_vm6 = vmor %vm437_vm13, %vm438_vm15  ;;  %786 = vmatpush.msra.mxu2 %v727_v23  ;;  %v750_v31 = vld [vmem:[#allocation11 + $0x138] sm:$0xff]  ;;  %v741_v60 = vld [vmem:[#allocation11 + $0xf0] sm:$0xff] }
 0x242   :  { %v645_v61 = vmul.f32 %v1936_v28, %v644_v37  ;;  %1352 = vmatmul.msk.f32.vlgmr.msrb.gmra.mxu2 %vm334_vm2, %v446_v50  ;;  %vm442_vm7 = vcmp.eq.f32.partialorder %v441_v10, 8.507059e+37  ;;  %v665_v18 = vand.u32 2147483647, %v1950_v29  ;;  %vm661_vm10 = vweird.f32 %v1950_v29  ;;  %v749_v37 = vld [vmem:[#allocation11 + $0x130] sm:$0xff]  ;;  %850 = vmatpush.msrb.mxu0 %v750_v31  ;;  %v736_v50 = vld [vmem:[#allocation11 + $0xc8] sm:$0xff] }
 0x243   :  { %v550_v3 = vadd.f32 %v1930_v21, %v549_v57  ;;  %v435_v51 = vmul.f32 %v1964_v47, %v434_v0  ;;  %787 = vmatpush.msra.mxu2 %v723_v33  ;;  %v668_v42 = vor.u32 1.1754944e-38, %v667_v15  ;;  %vm565_vm11 = vweird.f32 %v1959_v40  ;;  %827 = vmatpush.msrb.mxu1 %v749_v37  ;;  %v745_v57 = vld [vmem:[#allocation11 + $0x110] sm:$0xff]  ;;  %v882_v0 = vld [vmem:[#allocation13 + $0x78] sm:$0xff]  ;;  %v728_v10 = vld [vmem:[#allocation11 + $0x88] sm:$0xff] }
 0x244   :  { %v1432_v8 = vpop.eup %1431  ;;  %v646_v9 = vadd.f32 %v1936_v28, %v645_v61  ;;  %v572_v44 = vor.u32 1.1754944e-38, %v571_v26  ;;  %vm666_vm13 = vcmp.eq.f32.partialorder %v665_v18, 8.507059e+37  ;;  %v742_v61 = vld [vmem:[#allocation11 + $0xf8] sm:$0xff]  ;;  %851 = vmatpush.msrb.mxu0 %v746_v58  ;;  %v877_v23 = vld [vmem:[#allocation13 + $0x50] sm:$0xff]  ;;  %v875_v33 = vld [vmem:[#allocation13 + $0x40] sm:$0xff] }
 0x245   :  { %v1434_v12 = vpop.eup %1433  ;;  %v554_v13 = vsel %vm553_vm14, %v1930_v21, %v550_v3  ;;  %v657_v14 = vmul.f32 %v1432_v8, %v1950_v29  ;;  %v436_v21 = vadd.f32 %v1964_v47, %v435_v51  ;;  %vm662_vm8 = vweird.f32 %v1432_v8  ;;  %828 = vmatpush.msrb.mxu1 %v745_v57  ;;  %v738_v3 = vld [vmem:[#allocation11 + $0xd8] sm:$0xff]  ;;  %v880_v51 = vld [vmem:[#allocation13 + $0x68] sm:$0xff] }
 0x246   :  { %v559_v16 = vsel %vm1952_vm9, %v558_v53, %v554_v13  ;;  %v650_v17 = vsel %vm649_vm0, %v1936_v28, %v646_v9  ;;  %v561_v22 = vmul.f32 %v1434_v12, %v1959_v40  ;;  %vm566_vm9 = vweird.f32 %v1434_v12  ;;  %v748_v53 = vld [vmem:[#allocation11 + $0x128] sm:$0xff]  ;;  %852 = vmatpush.msrb.mxu0 %v742_v61  ;;  %v734_v9 = vld [vmem:[#allocation11 + $0xb8] sm:$0xff]  ;;  %v879_v13 = vld [vmem:[#allocation13 + $0x60] sm:$0xff] }
 0x247   :  { %v655_v45 = vsel %vm1982_vm12, %v654_v7, %v650_v17  ;;  %v658_v24 = vsub.f32 1.0, %v657_v14  ;;  %v574_v27 = vmul.f32 %v1862_v59, %v559_v16  ;;  %v440_v30 = vsel %vm439_vm6, %v1964_v47, %v436_v21  ;;  %vm663_vm12 = vmor %vm661_vm10, %vm662_vm8  ;;  %804 = vmatpush.msrb.mxu3 %v748_v53  ;;  %829 = vmatpush.msrb.mxu1 %v741_v60  ;;  %v732_v7 = vld [vmem:[#allocation11 + $0xa8] sm:$0xff]  ;;  %v725_v14 = vld [vmem:[#allocation11 + $0x70] sm:$0xff] }
 0x248   :  { %v562_v28 = vsub.f32 1.0, %v561_v22  ;;  %v670_v32 = vmul.f32 %v1866_v63, %v655_v45  ;;  %v445_v36 = vsel %vm442_vm7, %v444_v35, %v440_v30  ;;  %v569_v59 = vand.u32 2147483647, %v1959_v40  ;;  %vm567_vm14 = vmor %vm565_vm11, %vm566_vm9  ;;  %v719_v40 = vld [vmem:[#allocation11 + $0x40] sm:$0xff]  ;;  %853 = vmatpush.msrb.mxu0 %v738_v3  ;;  %v724_v35 = vld [vmem:[#allocation11 + $0x68] sm:$0xff] }
 0x249   :  { %v659_v34 = vmul.f32 %v1432_v8, %v658_v24  ;;  %1356 = vmatmul.msk.f32.vlgmr.msra.gmra.mxu1 %vm334_vm2, %v574_v27  ;;  %v447_v38 = vmul.f32 %v1864_v62, %v445_v36  ;;  %788 = vmatpush.msra.mxu2 %v719_v40  ;;  %v726_v15 = vld [vmem:[#allocation11 + $0x78] sm:$0xff]  ;;  %v720_v17 = vld [vmem:[#allocation11 + $0x48] sm:$0xff]  ;;  %v721_v22 = vld [vmem:[#allocation11 + $0x50] sm:$0xff] }
 0x24a   :  { %v563_v39 = vmul.f32 %v1434_v12, %v562_v28  ;;  %1358 = vmatmul.msk.f32.vlgmr.msra.gmra.mxu0 %vm334_vm2, %v670_v32  ;;  %vm570_vm15 = vcmp.eq.f32.partialorder %v569_v59, 8.507059e+37  ;;  %805 = vmatpush.msrb.mxu3 %v744_v55  ;;  %v878_v16 = vld [vmem:[#allocation13 + $0x58] sm:$0xff]  ;;  %v716_v45 = vld [vmem:[#allocation11 + $0x28] sm:$0xff]  ;;  %v717_v24 = vld [vmem:[#allocation11 + $0x30] sm:$0xff] }
 0x24b   :  { %v660_v63 = vadd.f32 %v1432_v8, %v659_v34  ;;  %1353 = vmatmul.msk.f32.gmra.mxu2 %vm334_vm2, %v447_v38  ;;  %830 = vmatpush.msrb.mxu1 %v737_v1  ;;  %v722_v21 = vld [vmem:[#allocation11 + $0x58] sm:$0xff]  ;;  %v876_v27 = vld [vmem:[#allocation13 + $0x48] sm:$0xff]  ;;  %v713_v30 = vld [vmem:[#allocation11 + $0x10] sm:$0xff] }
 0x24c   :  { %v564_v43 = vadd.f32 %v1434_v12, %v563_v39  ;;  %789 = vmatpush.msra.mxu2 %v715_v54  ;;  %854 = vmatpush.msrb.mxu0 %v734_v9  ;;  %v718_v26 = vld [vmem:[#allocation11 + $0x38] sm:$0xff]  ;;  %v712_v28 = vld [vmem:[#allocation11 + $0x8] sm:$0xff]  ;;  %v873_v36 = vld [vmem:[#allocation13 + $0x30] sm:$0xff] }
 0x24d   :  { %v664_v47 = vsel %vm663_vm12, %v1432_v8, %v660_v63  ;;  %v733_v8 = vld [vmem:[#allocation11 + $0xb0] sm:$0xff]  ;;  %v714_v32 = vld [vmem:[#allocation11 + $0x18] sm:$0xff]  ;;  %v872_v18 = vld [vmem:[#allocation13 + $0x28] sm:$0xff] }
 0x24e   :  { %v669_v62 = vsel %vm666_vm13, %v668_v42, %v664_v47  ;;  %v568_v48 = vsel %vm567_vm14, %v1434_v12, %v564_v43  ;;  %831 = vmatpush.msrb.mxu1 %v733_v8  ;;  %v730_v12 = vld [vmem:[#allocation11 + $0x98] sm:$0xff]  ;;  %v871_v39 = vld [vmem:[#allocation13 + $0x20] sm:$0xff]  ;;  %v869_v59 = vld [vmem:[#allocation13 + $0x10] sm:$0xff] }
 0x24f   :  { %v671_v49 = vmul.f32 %v1874_v5, %v669_v62  ;;  %v573_v52 = vsel %vm570_vm15, %v572_v44, %v568_v48  ;;  %v711_v5 = vld [vmem:[#allocation11] sm:$0xff]  ;;  %855 = vmatpush.msrb.mxu0 %v730_v12  ;;  %v874_v34 = vld [vmem:[#allocation13 + $0x38] sm:$0xff]  ;;  %v868_v42 = vld [vmem:[#allocation13 + $0x8] sm:$0xff] }
 0x250   :  { %v575_v29 = vmul.f32 %v1876_v6, %v573_v52  ;;  %v740_v6 = vld [vmem:[#allocation11 + $0xe8] sm:$0xff]  ;;  %790 = vmatpush.msra.mxu2 %v711_v5  ;;  %832 = vmatpush.msrb.mxu1 %v729_v11  ;;  %v870_v38 = vld [vmem:[#allocation13 + $0x18] sm:$0xff]  ;;  %v867_v47 = vld [vmem:[#allocation13] sm:$0xff] }
 0x251   :  { %806 = vmatpush.msrb.mxu3 %v740_v6  ;;  %856 = vmatpush.msrb.mxu0 %v726_v15  ;;  %v1401_v52 = vld [vmem:[%s2193_s5] ss:$0 sm:$0xff] }
 0x252   :  { %1359 = vmatmul.msk.f32.gmra.mxu0 %vm334_vm2, %v671_v49  ;;  %1357 = vmatmul.msk.f32.gmra.mxu1 %vm334_vm2, %v575_v29  ;;  %v906_v61 = vld [vmem:[%s2196_s8] sm:$0xf] }
 0x253   :  { %883 = vmatpush.msrb.mxu2 %v882_v0  ;;  %807 = vmatpush.msrb.mxu3 %v736_v50 }
 0x254   :  { %833 = vmatpush.msrb.mxu1 %v725_v14  ;;  %857 = vmatpush.msrb.mxu0 %v722_v21 }
 0x255   :  { %884 = vmatpush.msrb.mxu2 %v881_v4  ;;  %808 = vmatpush.msrb.mxu3 %v732_v7 }
 0x256   :  { %834 = vmatpush.msrb.mxu1 %v721_v22  ;;  %858 = vmatpush.msrb.mxu0 %v718_v26 }
 0x257   :  { %885 = vmatpush.msrb.mxu2 %v880_v51  ;;  %809 = vmatpush.msrb.mxu3 %v728_v10 }
 0x258   :  { %835 = vmatpush.msrb.mxu1 %v717_v24  ;;  %859 = vmatpush.msrb.mxu0 %v714_v32 }
 0x259   :  { %886 = vmatpush.msrb.mxu2 %v879_v13  ;;  %810 = vmatpush.msrb.mxu3 %v724_v35 }
 0x25a   :  { %836 = vmatpush.msrb.mxu1 %v713_v30 }
 0x25b   :  { %887 = vmatpush.msrb.mxu2 %v878_v16  ;;  %811 = vmatpush.msrb.mxu3 %v720_v17 }
 0x25d   :  { %888 = vmatpush.msrb.mxu2 %v877_v23  ;;  %812 = vmatpush.msrb.mxu3 %v716_v45 }
 0x25f   :  { %889 = vmatpush.msrb.mxu2 %v876_v27  ;;  %813 = vmatpush.msrb.mxu3 %v712_v28 }
 0x261   :  { %890 = vmatpush.msrb.mxu2 %v875_v33 }
 0x263   :  { %891 = vmatpush.msrb.mxu2 %v874_v34 }
 0x265   :  { %892 = vmatpush.msrb.mxu2 %v873_v36 }
 0x267   :  { %893 = vmatpush.msrb.mxu2 %v872_v18 }
 0x269   :  { %894 = vmatpush.msrb.mxu2 %v871_v39 }
 0x26b   :  { %895 = vmatpush.msrb.mxu2 %v870_v38 }
 0x26d   :  { %896 = vmatpush.msrb.mxu2 %v869_v59 }
 0x26f   :  { %897 = vmatpush.msrb.mxu2 %v868_v42 }
 0x271   :  { %898 = vmatpush.msrb.mxu2 %v867_v47 }
 0x2ba   :  { %v500_v63 = vpop.f32.mrf.mxu3 }
 0x2c3   :  { %v503_v53 = vpop.f32.mrf.mxu3 }
 0x2c5   :  { %v471_v44 = vpop.f32.mrf.mxu2 }
 0x2c6   :  { %v599_v43 = vpop.f32.mrf.mxu1  ;;  %v501_v62 = vadd.f32 %v500_v63, %v471_v44 }
 0x2c7   :  { %v695_v48 = vpop.f32.mrf.mxu0 }
 0x2c8   :  { %v605_v49 = vadd.f32 %v599_v43, %v501_v62 }
 0x2ca   :  { %v701_v29 = vadd.f32 %v695_v48, %v605_v49 }
 0x2cc   :  { %v707_v40 = vadd.f32 %v1401_v52, %v701_v29 }
 0x2ce   :  { %v474_v37 = vpop.f32.mrf.mxu2  ;;  %v709_v31 = vmax.f32 %v707_v40, 0.0 }
 0x2cf   :  { %v504_v54 = vadd.f32 %v503_v53, %v474_v37  ;;  %v602_v55 = vpop.f32.mrf.mxu1  ;;  %v698_v58 = vpop.f32.mrf.mxu0 }
 0x2d0   :  { %791 = vmatmul.f32.vlgmr.msra.gmra.mxu2 %v709_v31  ;;  %814 = vmatmul.f32.vlgmr.msrb.gmra.mxu3 %v709_v31 }
 0x2d1   :  { %v606_v57 = vadd.f32 %v602_v55, %v504_v54  ;;  %837 = vmatmul.f32.vlgmr.msrb.gmra.mxu1 %v709_v31  ;;  %860 = vmatmul.f32.vlgmr.msrb.gmra.mxu0 %v709_v31 }
 0x2d3   :  { %v702_v5 = vadd.f32 %v698_v58, %v606_v57 }
 0x2d5   :  { %v708_v6 = vadd.f32 %v1401_v52, %v702_v5 }
 0x2d7   :  { %v710_v60 = vmax.f32 %v708_v6, 0.0 }
 0x2d9   :  { %794 = vmatmul.f32.gmra.mxu2 %v710_v60  ;;  %817 = vmatmul.f32.gmra.mxu3 %v710_v60 }
 0x2da   :  { %840 = vmatmul.f32.gmra.mxu1 %v710_v60  ;;  %863 = vmatmul.f32.gmra.mxu0 %v710_v60 }
 0x2db   :  { %921 = vmatpush.xpose.msra.mxu3 %v710_v60 }
 0x2df   :  { %922 = vmatpush.xpose.msra.mxu3 %v709_v31 }
 0x2e1   :  { %899 = vmatmul.f32.vlgmr.msrb.gmra.mxu2 %v709_v31 }
 0x2e2   :  { %923 = vmatmul.f32.vlgmr.msra.gmra.mxu3 %v906_v61 }
 0x2e9   :  { %902 = vmatmul.f32.gmra.mxu2 %v710_v60 }
 0x34e   :  { %v838_v0 = vpop.f32.mrf.mxu1  ;;  %v861_v3 = vpop.f32.mrf.mxu0 }
 0x353   :  { %v792_v50 = vpop.f32.mrf.mxu2  ;;  %v815_v1 = vpop.f32.mrf.mxu3 }
 0x357   :  { %v841_v4 = vpop.f32.mrf.mxu1  ;;  %v864_v9 = vpop.f32.mrf.mxu0 }
 0x358   :  { %1202 = vmatpush.msra.mxu0 %v841_v4 }
 0x35a   :  { %1203 = vmatpush.msra.mxu0 %v838_v0 }
 0x35c   :  { %v795_v7 = vpop.f32.mrf.mxu2  ;;  %v818_v8 = vpop.f32.mrf.mxu3 }
 0x35d   :  { %1079 = vmatpush.msra.mxu1 %v818_v8  ;;  %1108 = vmatpush.msrb.mxu3 %v795_v7 }
 0x35f   :  { %1080 = vmatpush.msra.mxu1 %v815_v1  ;;  %1109 = vmatpush.msrb.mxu3 %v792_v50 }
 0x361   :  { %1298 = vmatpush.msrb.mxu1 %v864_v9 }
 0x363   :  { %1299 = vmatpush.msrb.mxu1 %v861_v3 }
 0x364   :  { %v900_v51 = vpop.f32.mrf.mxu2 }
 0x365   :  { %929 = vperm.xlu1 %1395, %v900_v51   ;;  %995 = vperm.xlu0 %1389, %v900_v51   ;;  %v924_v11 = vpop.f32.mrf.mxu3 }
 0x366   :  { %v1002_v12 = vperm.slane %v924_v11, 1  ;;  %v937_v16 = vperm.slane %v924_v11, 0  ;;  %v1221_v27 = vperm.slane %v924_v11, 3  ;;  %v1125_v33 = vperm.slane %v924_v11, 2 }
 0x36c   :  { %v903_v10 = vpop.f32.mrf.mxu2 }
 0x36d   :  { %1396 = vset.pattern.permute.xlu1 %v1680_v19  ;;  %1399 = vset.pattern.permute.xlu0 %v1681_v20 }
 0x36e   :  { %999 = vperm.xlu2 %1397, %v903_v10   ;;  %1118 = vperm.xlu1 %1396, %v900_v51  }
 0x36f   :  { %934 = vperm.xlu0 %1399, %v903_v10  }
 0x376   :  { %1398 = vset.pattern.permute.xlu2 %v1682_v25  ;;  %1122 = vperm.xlu1 %1396, %v903_v10  }
 0x377   :  { %1400 = vset.pattern.permute.xlu0 %v1682_v25  ;;  %1214 = vperm.xlu2 %1398, %v900_v51  }
 0x378   :  { %1218 = vperm.xlu0 %1400, %v903_v10  }
 0x3c8   :  { %v1000_v13 = vpop.permute.xlu2 %999 }
 0x3c9   :  { %v1004_v35 = vadd.f32 %v1002_v12, %v1000_v13 }
 0x3cb   :  { %v1006_v14 = vmul.f32 0.2, %v1004_v35 }
 0x3cd   :  { %v1008_v15 = vmax.f32 %v1004_v35, %v1006_v14 }
 0x3cf   :  { %v1010_v19 = vsel %vm327_vm4, %v1008_v15, -1e+30 }
 0x3d0   :  { %v1014_v20 = vsel %vm334_vm2, %v1010_v19, -inf }
 0x3d1   :  { %1015 = vmax.xlane.f32.xlu0 %v1014_v20  ;;  %v1215_v32 = vpop.permute.xlu2 %1214 }
 0x3d2   :  { %v1222_v59 = vadd.f32 %v1221_v27, %v1215_v32 }
 0x3d4   :  { %v1224_v47 = vmul.f32 0.2, %v1222_v59 }
 0x3d6   :  { %v1226_v53 = vmax.f32 %v1222_v59, %v1224_v47 }
 0x3d7   :  { %v930_v17 = vpop.permute.xlu1 %929  ;;  %v996_v22 = vpop.permute.xlu0 %995 }
 0x3d8   :  { %v938_v21 = vadd.f32 %v937_v16, %v930_v17  ;;  %v1003_v23 = vadd.f32 %v1002_v12, %v996_v22  ;;  %v1228_v58 = vsel %vm520_vm3, %v1226_v53, -1e+30 }
 0x3d9   :  { %v1230_v60 = vsel %vm334_vm2, %v1228_v58, -inf }
 0x3da   :  { %v940_v25 = vmul.f32 0.2, %v938_v21  ;;  %v1005_v45 = vmul.f32 0.2, %v1003_v23 }
 0x3dc   :  { %v942_v24 = vmax.f32 %v938_v21, %v940_v25  ;;  %v1007_v26 = vmax.f32 %v1003_v23, %v1005_v45 }
 0x3de   :  { %v944_v28 = vsel %vm326_vm1, %v942_v24, -1e+30  ;;  %v1009_v30 = vsel %vm326_vm1, %v1007_v26, -1e+30 }
 0x3df   :  { %v946_v34 = vsel %vm334_vm2, %v944_v28, -inf  ;;  %v1011_v36 = vsel %vm334_vm2, %v1009_v30, -inf }
 0x3e0   :  { %v1119_v18 = vpop.permute.xlu1 %1118  ;;  %947 = vmax.xlane.f32.xlu1 %v946_v34  ;;  %1012 = vmax.xlane.f32.xlu2 %v1011_v36 }
 0x3e1   :  { %v1126_v39 = vadd.f32 %v1125_v33, %v1119_v18  ;;  %v935_v38 = vpop.permute.xlu0 %934 }
 0x3e2   :  { %v939_v63 = vadd.f32 %v937_v16, %v935_v38 }
 0x3e3   :  { %v1128_v42 = vmul.f32 0.2, %v1126_v39 }
 0x3e4   :  { %v941_v43 = vmul.f32 0.2, %v939_v63 }
 0x3e5   :  { %v1130_v44 = vmax.f32 %v1126_v39, %v1128_v42 }
 0x3e6   :  { %v943_v62 = vmax.f32 %v939_v63, %v941_v43 }
 0x3e7   :  { %v1132_v41 = vsel %vm520_vm3, %v1130_v44, -1e+30 }
 0x3e8   :  { %v1123_v48 = vpop.permute.xlu1 %1122  ;;  %v1134_v49 = vsel %vm334_vm2, %v1132_v41, -inf  ;;  %v945_v52 = vsel %vm327_vm4, %v943_v62, -1e+30 }
 0x3e9   :  { %v1127_v29 = vadd.f32 %v1125_v33, %v1123_v48  ;;  %1135 = vmax.xlane.f32.xlu1 %v1134_v49  ;;  %v949_v40 = vsel %vm334_vm2, %v945_v52, -inf }
 0x3ea   :  { %v1219_v37 = vpop.permute.xlu0 %1218  ;;  %950 = vmax.xlane.f32.xlu2 %v949_v40 }
 0x3eb   :  { %v1129_v31 = vmul.f32 0.2, %v1127_v29  ;;  %v1223_v54 = vadd.f32 %v1221_v27, %v1219_v37 }
 0x3ed   :  { %v1131_v55 = vmax.f32 %v1127_v29, %v1129_v31  ;;  %v1225_v57 = vmul.f32 0.2, %v1223_v54 }
 0x3ef   :  { %v1227_v5 = vmax.f32 %v1223_v54, %v1225_v57  ;;  %v1133_v6 = vsel %vm521_vm5, %v1131_v55, -1e+30 }
 0x3f0   :  { %v1137_v56 = vsel %vm334_vm2, %v1133_v6, -inf }
 0x3f1   :  { %1138 = vmax.xlane.f32.xlu1 %v1137_v56  ;;  %v1229_v61 = vsel %vm521_vm5, %v1227_v5, -1e+30 }
 0x3f2   :  { %1231 = vmax.xlane.f32.xlu2 %v1230_v60  ;;  %v1233_v0 = vsel %vm334_vm2, %v1229_v61, -inf }
 0x3f3   :  { %1234 = vmax.xlane.f32.xlu0 %v1233_v0 }
 0x444   :  { %v1016_v50 = vpop.xlane.xlu0 %1015 }
 0x445   :  { %v1018_v1 = vsub.f32 %v1010_v19, %v1016_v50 }
 0x447   :  { %v1021_v46 = vmul.f32 1.442695, %v1018_v1 }
 0x449   :  { %1435 = vpow2.f32 %v1021_v46 }
 0x44f   :  { %v2064_v3 = vpop.eup %1435 }
 0x450   :  { %v1026_v4 = vsel %vm334_vm2, %v2064_v3, 0.0 }
 0x451   :  { %1027 = vadd.xlane.f32.xlu0 %v1026_v4 }
 0x453   :  { %v948_v7 = vpop.xlane.xlu1 %947  ;;  %v1013_v8 = vpop.xlane.xlu2 %1012 }
 0x454   :  { %v952_v9 = vsub.f32 %v944_v28, %v948_v7  ;;  %v1017_v51 = vsub.f32 %v1009_v30, %v1013_v8 }
 0x456   :  { %v954_v2 = vmul.f32 1.442695, %v952_v9  ;;  %v1019_v10 = vmul.f32 1.442695, %v1017_v51 }
 0x458   :  { %1437 = vpow2.f32 %v954_v2 }
 0x459   :  { %1439 = vpow2.f32 %v1019_v10 }
 0x45c   :  { %v1136_v11 = vpop.xlane.xlu1 %1135 }
 0x45d   :  { %v1140_v12 = vsub.f32 %v1132_v41, %v1136_v11  ;;  %v951_v13 = vpop.xlane.xlu2 %950 }
 0x45e   :  { %v2068_v35 = vpop.eup %1437  ;;  %v953_v14 = vsub.f32 %v945_v52, %v951_v13 }
 0x45f   :  { %v2070_v15 = vpop.eup %1439  ;;  %v1142_v19 = vmul.f32 1.442695, %v1140_v12  ;;  %v958_v20 = vsel %vm334_vm2, %v2068_v35, 0.0 }
 0x460   :  { %v956_v16 = vmul.f32 1.442695, %v953_v14  ;;  %959 = vadd.xlane.f32.xlu1 %v958_v20  ;;  %v1023_v17 = vsel %vm334_vm2, %v2070_v15, 0.0 }
 0x461   :  { %1441 = vpow2.f32 %v1142_v19  ;;  %1024 = vadd.xlane.f32.xlu2 %v1023_v17 }
 0x462   :  { %1443 = vpow2.f32 %v956_v16 }
 0x464   :  { %v1139_v22 = vpop.xlane.xlu1 %1138 }
 0x465   :  { %v1141_v21 = vsub.f32 %v1133_v6, %v1139_v22  ;;  %v1232_v23 = vpop.xlane.xlu2 %1231 }
 0x466   :  { %v1236_v25 = vsub.f32 %v1228_v58, %v1232_v23  ;;  %v1235_v45 = vpop.xlane.xlu0 %1234 }
 0x467   :  { %v2076_v24 = vpop.eup %1441  ;;  %v1144_v26 = vmul.f32 1.442695, %v1141_v21  ;;  %v1237_v27 = vsub.f32 %v1229_v61, %v1235_v45 }
 0x468   :  { %v2078_v28 = vpop.eup %1443  ;;  %v1238_v30 = vmul.f32 1.442695, %v1236_v25  ;;  %v1146_v32 = vsel %vm334_vm2, %v2076_v24, 0.0 }
 0x469   :  { %1445 = vpow2.f32 %v1144_v26  ;;  %v1240_v33 = vmul.f32 1.442695, %v1237_v27  ;;  %1147 = vadd.xlane.f32.xlu1 %v1146_v32  ;;  %v961_v34 = vsel %vm334_vm2, %v2078_v28, 0.0 }
 0x46a   :  { %1447 = vpow2.f32 %v1238_v30  ;;  %962 = vadd.xlane.f32.xlu2 %v961_v34 }
 0x46b   :  { %1449 = vpow2.f32 %v1240_v33 }
 0x46f   :  { %v2084_v36 = vpop.eup %1445 }
 0x470   :  { %v2086_v18 = vpop.eup %1447  ;;  %v1149_v39 = vsel %vm334_vm2, %v2084_v36, 0.0 }
 0x471   :  { %v2090_v38 = vpop.eup %1449  ;;  %v1242_v59 = vsel %vm334_vm2, %v2086_v18, 0.0 }
 0x472   :  { %1150 = vadd.xlane.f32.xlu2 %v1149_v39  ;;  %1243 = vadd.xlane.f32.xlu0 %v1242_v59  ;;  %v1245_v63 = vsel %vm334_vm2, %v2090_v38, 0.0 }
 0x473   :  { %1246 = vadd.xlane.f32.xlu1 %v1245_v63 }
 0x4c4   :  { %v2096_v42 = vpop.xlane.xlu0 %1027 }
 0x4c5   :  { %1451 = vrcp.f32 %v2096_v42  ;;  %vm1048_vm7 = vweird.f32 %v2096_v42  ;;  %v1054_v4 = vand.u32 2147483648, %v2096_v42  ;;  %v1052_v45 = vand.u32 2147483647, %v2096_v42 }
 0x4c7   :  { %v1055_v32 = vor.u32 1.1754944e-38, %v1054_v4 }
 0x4cb   :  { %v2099_v47 = vpop.eup %1451 }
 0x4cc   :  { %v1044_v41 = vmul.f32 %v2099_v47, %v2096_v42  ;;  %vm1049_vm9 = vweird.f32 %v2099_v47 }
 0x4cd   :  { %vm2143_vm13 = vmor %vm1048_vm7, %vm1049_vm9 }
 0x4ce   :  { %v1045_v37 = vsub.f32 1.0, %v1044_v41 }
 0x4d0   :  { %v1046_v6 = vmul.f32 %v2099_v47, %v1045_v37 }
 0x4d2   :  { %v1047_v20 = vadd.f32 %v2099_v47, %v1046_v6 }
 0x4d3   :  { %v960_v43 = vpop.xlane.xlu1 %959 }
 0x4d4   :  { %1453 = vrcp.f32 %v960_v43  ;;  %v1025_v44 = vpop.xlane.xlu2 %1024  ;;  %v975_v31 = vand.u32 2147483648, %v960_v43  ;;  %v973_v57 = vand.u32 2147483647, %v960_v43  ;;  %vm969_vm3 = vweird.f32 %v960_v43 }
 0x4d5   :  { %1455 = vrcp.f32 %v1025_v44  ;;  %v1040_v61 = vand.u32 2147483648, %v1025_v44  ;;  %vm1034_vm6 = vweird.f32 %v1025_v44  ;;  %v1038_v1 = vand.u32 2147483647, %v1025_v44 }
 0x4d6   :  { %v976_v56 = vor.u32 1.1754944e-38, %v975_v31  ;;  %vm974_vm0 = vcmp.eq.f32.partialorder %v973_v57, 8.507059e+37  ;;  %v1051_v42 = vsel %vm2143_vm13, %v2099_v47, %v1047_v20 }
 0x4d7   :  { %v1041_v13 = vor.u32 1.1754944e-38, %v1040_v61  ;;  %vm1039_vm10 = vcmp.eq.f32.partialorder %v1038_v1, 8.507059e+37 }
 0x4da   :  { %v1454_v62 = vpop.eup %1453 }
 0x4db   :  { %v1456_v48 = vpop.eup %1455  ;;  %v965_v49 = vmul.f32 %v1454_v62, %v960_v43  ;;  %vm970_vm1 = vweird.f32 %v1454_v62 }
 0x4dc   :  { %v1030_v52 = vmul.f32 %v1456_v48, %v1025_v44  ;;  %v2103_v29 = vpop.xlane.xlu1 %1147  ;;  %vm1035_vm4 = vweird.f32 %v1456_v48  ;;  %vm971_vm5 = vmor %vm969_vm3, %vm970_vm1 }
 0x4dd   :  { %v966_v40 = vsub.f32 1.0, %v965_v49  ;;  %1457 = vrcp.f32 %v2103_v29  ;;  %v2106_v53 = vpop.xlane.xlu2 %962  ;;  %vm2113_vm8 = vmor %vm1034_vm6, %vm1035_vm4  ;;  %v1163_v16 = vand.u32 2147483648, %v2103_v29  ;;  %v1161_v21 = vand.u32 2147483647, %v2103_v29 }
 0x4de   :  { %v1031_v54 = vsub.f32 1.0, %v1030_v52  ;;  %1459 = vrcp.f32 %v2106_v53  ;;  %v989_v25 = vand.u32 2147483648, %v2106_v53  ;;  %vm1157_vm12 = vweird.f32 %v2103_v29 }
 0x4df   :  { %v967_v55 = vmul.f32 %v1454_v62, %v966_v40  ;;  %v987_v30 = vand.u32 2147483647, %v2106_v53  ;;  %v1164_v33 = vor.u32 1.1754944e-38, %v1163_v16  ;;  %vm1162_vm1 = vcmp.eq.f32.partialorder %v1161_v21, 8.507059e+37 }
 0x4e0   :  { %v1032_v58 = vmul.f32 %v1456_v48, %v1031_v54  ;;  %vm983_vm3 = vweird.f32 %v2106_v53  ;;  %vm1053_vm4 = vcmp.eq.f32.partialorder %v1052_v45, 8.507059e+37 }
 0x4e1   :  { %v968_v5 = vadd.f32 %v1454_v62, %v967_v55  ;;  %v1056_v40 = vsel %vm1053_vm4, %v1055_v32, %v1051_v42 }
 0x4e2   :  { %v1033_v60 = vadd.f32 %v1456_v48, %v1032_v58 }
 0x4e3   :  { %v1458_v0 = vpop.eup %1457  ;;  %v972_v50 = vsel %vm971_vm5, %v1454_v62, %v968_v5  ;;  %v990_v62 = vor.u32 1.1754944e-38, %v989_v25 }
 0x4e4   :  { %v1460_v46 = vpop.eup %1459  ;;  %v977_v7 = vsel %vm974_vm0, %v976_v56, %v972_v50  ;;  %v1153_v9 = vmul.f32 %v1458_v0, %v2103_v29  ;;  %v1037_v51 = vsel %vm2113_vm8, %v1456_v48, %v1033_v60  ;;  %vm1158_vm11 = vweird.f32 %v1458_v0 }
 0x4e5   :  { %v979_v2 = vmul.f32 %v1460_v46, %v2106_v53  ;;  %v2121_v10 = vpop.xlane.xlu0 %1243  ;;  %v2123_v11 = vpop.xlane.xlu2 %1150  ;;  %v992_v12 = vmul.f32 %v2068_v35, %v977_v7  ;;  %v1042_v22 = vsel %vm1039_vm10, %v1041_v13, %v1037_v51  ;;  %vm984_vm14 = vweird.f32 %v1460_v46  ;;  %vm1159_vm15 = vmor %vm1157_vm12, %vm1158_vm11 }
 0x4e6   :  { %v1154_v14 = vsub.f32 1.0, %v1153_v9  ;;  %1461 = vrcp.f32 %v2121_v10  ;;  %v2128_v19 = vpop.xlane.xlu1 %1246  ;;  %v1057_v34 = vmul.f32 %v2070_v15, %v1042_v22  ;;  %vm985_vm5 = vmor %vm983_vm3, %vm984_vm14  ;;  %vm988_vm0 = vcmp.eq.f32.partialorder %v987_v30, 8.507059e+37 }
 0x4e7   :  { %v980_v17 = vsub.f32 1.0, %v979_v2  ;;  %1463 = vrcp.f32 %v2123_v11  ;;  %1362 = vmatmul.msk.f32.vlgmr.msrb.gmra.mxu3 %vm334_vm2, %v992_v12  ;;  %v1259_v53 = vand.u32 2147483648, %v2121_v10  ;;  %v1257_v57 = vand.u32 2147483647, %v2121_v10 }
 0x4e8   :  { %v1155_v35 = vmul.f32 %v1458_v0, %v1154_v14  ;;  %1465 = vrcp.f32 %v2128_v19  ;;  %1360 = vmatmul.msk.f32.vlgmr.msra.gmra.mxu1 %vm334_vm2, %v1057_v34  ;;  %v1177_v58 = vand.u32 2147483648, %v2123_v11  ;;  %v1175_v5 = vand.u32 2147483647, %v2123_v11 }
 0x4e9   :  { %v981_v23 = vmul.f32 %v1460_v46, %v980_v17  ;;  %vm1253_vm8 = vweird.f32 %v2121_v10  ;;  %v1260_v60 = vor.u32 1.1754944e-38, %v1259_v53  ;;  %vm1171_vm10 = vweird.f32 %v2123_v11 }
 0x4ea   :  { %v1156_v26 = vadd.f32 %v1458_v0, %v1155_v35  ;;  %vm1258_vm11 = vcmp.eq.f32.partialorder %v1257_v57, 8.507059e+37  ;;  %v1178_v50 = vor.u32 1.1754944e-38, %v1177_v58  ;;  %vm1176_vm13 = vcmp.eq.f32.partialorder %v1175_v5, 8.507059e+37 }
 0x4eb   :  { %v982_v39 = vadd.f32 %v1460_v46, %v981_v23  ;;  %v1273_v51 = vand.u32 2147483648, %v2128_v19  ;;  %v1271_v2 = vand.u32 2147483647, %v2128_v19 }
 0x4ec   :  { %v1462_v59 = vpop.eup %1461  ;;  %v1160_v63 = vsel %vm1159_vm15, %v1458_v0, %v1156_v26  ;;  %vm1267_vm15 = vweird.f32 %v2128_v19 }
 0x4ed   :  { %v1464_v43 = vpop.eup %1463  ;;  %v1165_v44 = vsel %vm1162_vm1, %v1164_v33, %v1160_v63  ;;  %v1249_v41 = vmul.f32 %v1462_v59, %v2121_v10  ;;  %v986_v48 = vsel %vm985_vm5, %v1460_v46, %v982_v39  ;;  %vm1254_vm6 = vweird.f32 %v1462_v59 }
 0x4ee   :  { %v1167_v15 = vmul.f32 %v1464_v43, %v2123_v11  ;;  %v1180_v49 = vmul.f32 %v2076_v24, %v1165_v44  ;;  %v1466_v52 = vpop.eup %1465  ;;  %v991_v47 = vsel %vm988_vm0, %v990_v62, %v986_v48  ;;  %vm1172_vm7 = vweird.f32 %v1464_v43  ;;  %vm1255_vm9 = vmor %vm1253_vm8, %vm1254_vm6 }
 0x4ef   :  { %v1250_v29 = vsub.f32 1.0, %v1249_v41  ;;  %v1263_v31 = vmul.f32 %v1466_v52, %v2128_v19  ;;  %v993_v54 = vmul.f32 %v2078_v28, %v991_v47  ;;  %v1058_v28 = vmul.f32 %v2064_v3, %v1056_v40  ;;  %vm1173_vm12 = vmor %vm1171_vm10, %vm1172_vm7  ;;  %v1402_v19 = vld [vmem:[%s2197_s9] ss:$0 sm:$0xff] }
 0x4f0   :  { %v1168_v37 = vsub.f32 1.0, %v1167_v15  ;;  %1364 = vmatmul.msk.f32.vlgmr.msra.gmra.mxu0 %vm334_vm2, %v1180_v49  ;;  %vm1268_vm14 = vweird.f32 %v1466_v52  ;;  %v1274_v11 = vor.u32 1.1754944e-38, %v1273_v51  ;;  %vm1272_vm3 = vcmp.eq.f32.partialorder %v1271_v2, 8.507059e+37 }
 0x4f1   :  { %v1251_v55 = vmul.f32 %v1462_v59, %v1250_v29  ;;  %v1264_v6 = vsub.f32 1.0, %v1263_v31  ;;  %1363 = vmatmul.msk.f32.gmra.mxu3 %vm334_vm2, %v993_v54  ;;  %1361 = vmatmul.msk.f32.gmra.mxu1 %vm334_vm2, %v1058_v28  ;;  %vm1269_vm1 = vmor %vm1267_vm15, %vm1268_vm14 }
 0x4f2   :  { %v1169_v24 = vmul.f32 %v1464_v43, %v1168_v37 }
 0x4f3   :  { %v1252_v56 = vadd.f32 %v1462_v59, %v1251_v55  ;;  %v1265_v1 = vmul.f32 %v1466_v52, %v1264_v6 }
 0x4f4   :  { %v1170_v61 = vadd.f32 %v1464_v43, %v1169_v24 }
 0x4f5   :  { %v1256_v0 = vsel %vm1255_vm9, %v1462_v59, %v1252_v56  ;;  %v1266_v9 = vadd.f32 %v1466_v52, %v1265_v1 }
 0x4f6   :  { %v1261_v46 = vsel %vm1258_vm11, %v1260_v60, %v1256_v0  ;;  %v1174_v4 = vsel %vm1173_vm12, %v1464_v43, %v1170_v61 }
 0x4f7   :  { %v1179_v7 = vsel %vm1176_vm13, %v1178_v50, %v1174_v4  ;;  %v1276_v3 = vmul.f32 %v2086_v18, %v1261_v46  ;;  %v1270_v10 = vsel %vm1269_vm1, %v1466_v52, %v1266_v9 }
 0x4f8   :  { %v1181_v8 = vmul.f32 %v2084_v36, %v1179_v7  ;;  %v1275_v12 = vsel %vm1272_vm3, %v1274_v11, %v1270_v10 }
 0x4f9   :  { %1366 = vmatmul.msk.f32.vlgmr.msrb.gmra.mxu1 %vm334_vm2, %v1276_v3  ;;  %v1277_v36 = vmul.f32 %v2090_v38, %v1275_v12 }
 0x4fa   :  { %1365 = vmatmul.msk.f32.gmra.mxu0 %vm334_vm2, %v1181_v8 }
 0x501   :  { %1367 = vmatmul.msk.f32.gmra.mxu1 %vm334_vm2, %v1277_v36 }
 0x565   :  { %v1082_v18 = vpop.f32.mrf.mxu1 }
 0x56a   :  { %v1111_v13 = vpop.f32.mrf.mxu3 }
 0x56b   :  { %v1112_v16 = vadd.f32 %v1111_v13, %v1082_v18 }
 0x56d   :  { %v1205_v20 = vpop.f32.mrf.mxu0 }
 0x56e   :  { %v1085_v14 = vpop.f32.mrf.mxu1  ;;  %v1211_v17 = vadd.f32 %v1205_v20, %v1112_v16 }
 0x574   :  { %v1114_v22 = vpop.f32.mrf.mxu3 }
 0x575   :  { %v1115_v23 = vadd.f32 %v1114_v22, %v1085_v14 }
 0x576   :  { %v1301_v35 = vpop.f32.mrf.mxu1 }
 0x577   :  { %v1307_v21 = vadd.f32 %v1301_v35, %v1211_v17  ;;  %v1208_v45 = vpop.f32.mrf.mxu0 }
 0x578   :  { %v1212_v38 = vadd.f32 %v1208_v45, %v1115_v23 }
 0x579   :  { %v1313_v25 = vadd.f32 %v1402_v19, %v1307_v21 }
 0x57b   :  { %1315 = vst [vmem:[#allocation14] sm:$0xff] %v1313_v25 }
 0x57e   :  { %v1304_v26 = vpop.f32.mrf.mxu1 }
 0x57f   :  { %v1308_v27 = vadd.f32 %v1304_v26, %v1212_v38 }
 0x581   :  { %v1314_v30 = vadd.f32 %v1402_v19, %v1308_v27 }
 0x583   :  { %1316 = vst [vmem:[#allocation14 + $0x8] sm:$0xff] %v1314_v30 }
 0x584   :  { %1329 = dma.vmem_to_hbm [thread:$0]  %s1322_s30, 256, %s1324_s13, [#allocation4], %s1670_s21, %s1670_s21, %s1671_s22  }
 0x585   :  { %1667 = dma.done.wait [#allocation4], 256  }
 0x586   :  { %1668 = vsyncadd [#allocation4], 4294967040 }
 0x587   :  { %1334 = vsyncpa [#allocation3], 1 }
 0x588   :  { %1335 = vsyncpa [#allocation6], 1 }
 0x589   :  { %1336 = vsyncpa [#allocation9], 1 }
 0x58a   :  { %1337 = vsyncpa [#allocation12], 1 }
 0x58b   :  { %1338 = vsyncpa [#allocation4], 1 }

</bundles_post_ra>
